<compile_context>
chip_gen: v7x
topology: tpu7x:2x2x1
jax: 0.10.0
libtpu: 0.0.40
codegen_flags: <defaults>
</compile_context>

<pallas_src>
import math
from functools import partial

import jax
import jax.numpy as jnp
from jax.experimental import pallas as pl
from jax.experimental.pallas import tpu as pltpu

NEG_SLOPE = 0.02
LN_EPS = 1e-5


# ---------------------------------------------------------------------------
# Kernel
# ---------------------------------------------------------------------------
def _make_kernel(fuse_temb: bool):
    """Build the fused ConditionalMLP kernel.

    Ref layout (per grid step over batch tiles of TB rows):
      x_ref     [TB, in_dim]
      feat_ref  [TB, 1]  raw timesteps (fuse_temb=True)  OR  [TB, base_dim] temb0
      we1_ref   [base_dim, temb_dim]      embed.0 weight
      be12_ref  [2, temb_dim]             row0 = embed.0 bias, row1 = embed.2 bias
      we2_ref   [temb_dim, temb_dim]      embed.2 weight
      win_ref   [in_dim, base_dim]        in_fc weight
      wproj_ref [temb_dim, L*D]           per-layer proj weights, lane-concatenated
      wlin_ref  [D, L*D]                  per-layer in_fc weights, lane-concatenated
      wlout_ref [D, L*D]                  per-layer out_fc weights, lane-concatenated
      vecs_ref  [8, L*D]  rows: 0 ln_in gamma, 1 ln_in beta, 2 layer-in bias,
                                3 proj bias, 4 ln_out gamma, 5 ln_out beta,
                                6 layer-out bias, 7 model in_fc bias (cols 0:D)
      wout_ref  [D, out_dim], bout_ref [1, out_dim]
      o_ref     [TB, out_dim]
    """

    def kernel(x_ref, feat_ref, we1_ref, be12_ref, we2_ref, win_ref,
               wproj_ref, wlin_ref, wlout_ref, vecs_ref, wout_ref, bout_ref,
               o_ref):
        f32 = jnp.float32
        TB = x_ref.shape[0]
        D = win_ref.shape[1]          # base_dim
        LD = wlin_ref.shape[1]        # num_layers * D
        num_layers = LD // D

        def lrelu(v):
            return jnp.where(v >= 0, v, NEG_SLOPE * v)

        def layernorm(v, g, b):
            mu = jnp.mean(v, axis=-1, keepdims=True)
            c = v - mu
            var = jnp.mean(c * c, axis=-1, keepdims=True)
            return c * jax.lax.rsqrt(var + LN_EPS) * g + b

        be12 = be12_ref[...]
        vecs = vecs_ref[...]
        wlin = wlin_ref[...]
        wlout = wlout_ref[...]

        if fuse_temb:
            # DDPM-style sinusoidal timestep embedding, computed in-kernel.
            half = D // 2
            lane = jax.lax.broadcasted_iota(jnp.int32, (TB, D), 1)
            k = jnp.where(lane < half, lane, lane - half).astype(f32)
            freqs = jnp.exp(-math.log(10000.0) * k / (half - 1))
            args = feat_ref[...] * freqs                        # [TB,1] * [TB,D]
            temb0 = jnp.where(lane < half, jnp.sin(args), jnp.cos(args))
        else:
            temb0 = feat_ref[...]                               # precomputed [TB, D]

        # ----- self.embed: Linear -> LeakyReLU -> Linear -----
        h = jnp.dot(temb0, we1_ref[...], preferred_element_type=f32) + be12[0:1, :]
        t_emb = jnp.dot(lrelu(h), we2_ref[...], preferred_element_type=f32) + be12[1:2, :]
        t_act = lrelu(t_emb)                                    # shared by every layer.proj

        # ----- all per-layer time projections in ONE lane-dense matmul [TB, L*D] -----
        cond = jnp.dot(t_act, wproj_ref[...], preferred_element_type=f32) + vecs[3:4, :]

        # ----- self.in_fc -----
        out = jnp.dot(x_ref[...], win_ref[...], preferred_element_type=f32) + vecs[7:8, :D]

        # ----- ConditionalLayer x L (multiplier == 1 -> constant width D) -----
        for i in range(num_layers):                             # static unroll (L tiny)
            c0, c1 = i * D, (i + 1) * D
            h = lrelu(layernorm(out, vecs[0:1, c0:c1], vecs[1:2, c0:c1]))
            h = jnp.dot(h, wlin[:, c0:c1], preferred_element_type=f32) + vecs[2:3, c0:c1]
            h = h + cond[:, c0:c1]
            # drop_rate == 0.0 -> Dropout1d is Identity
            h = lrelu(layernorm(h, vecs[4:5, c0:c1], vecs[5:6, c0:c1]))
            out = jnp.dot(h, wlout[:, c0:c1], preferred_element_type=f32) + vecs[6:7, c0:c1]

        # ----- self.out_fc: LeakyReLU -> Linear -----
        o_ref[...] = (jnp.dot(lrelu(out), wout_ref[...], preferred_element_type=f32)
                      + bout_ref[...]).astype(o_ref.dtype)

    return kernel


# ---------------------------------------------------------------------------
# Glue: timestep embedding (host fallback), parameter init, wrapper.
# ---------------------------------------------------------------------------
def get_timestep_embedding(t, embedding_dim):
    """DDPM-style sinusoidal timestep embedding (embedding_dim assumed even)."""
    half = embedding_dim // 2
    freqs = jnp.exp(-math.log(10000.0) * jnp.arange(half, dtype=jnp.float32) / (half - 1))
    args = t.astype(jnp.float32)[:, None] * freqs[None, :]
    return jnp.concatenate([jnp.sin(args), jnp.cos(args)], axis=-1)


def init_params(key, in_dim, base_dim, temb_dim, num_layers, out_dim):
    D, L = base_dim, num_layers

    def linear(key, fan_in, fan_out):
        kw, kb = jax.random.split(key)
        bound = 1.0 / math.sqrt(fan_in)
        w = jax.random.uniform(kw, (fan_in, fan_out), jnp.float32, -bound, bound)
        b = jax.random.uniform(kb, (fan_out,), jnp.float32, -bound, bound)
        return w, b

    keys = jax.random.split(key, 5)
    we1, be1 = linear(keys[0], D, temb_dim)
    we2, be2 = linear(keys[1], temb_dim, temb_dim)
    win, bin_ = linear(keys[2], in_dim, D)
    wout, bout = linear(keys[4], D, out_dim)

    lk = jax.random.split(keys[3], L * 3).reshape(L, 3, 2)
    wlin, blin, wproj, bproj, wlout, blout = [], [], [], [], [], []
    for i in range(L):
        w, b = linear(lk[i, 0], D, D); wlin.append(w); blin.append(b)
        w, b = linear(lk[i, 1], temb_dim, D); wproj.append(w); bproj.append(b)
        w, b = linear(lk[i, 2], D, D); wlout.append(w); blout.append(b)

    cat = lambda xs: jnp.concatenate(xs, axis=0)                 # -> [L*D]
    row_bin = jnp.zeros((L * D,), jnp.float32).at[:D].set(bin_)  # in_fc bias in cols 0:D
    vecs = jnp.stack([
        jnp.ones((L * D,), jnp.float32),    # 0: ln_in gamma  (PyTorch default init)
        jnp.zeros((L * D,), jnp.float32),   # 1: ln_in beta
        cat(blin),                          # 2: layer in_fc bias
        cat(bproj),                         # 3: proj bias
        jnp.ones((L * D,), jnp.float32),    # 4: ln_out gamma
        jnp.zeros((L * D,), jnp.float32),   # 5: ln_out beta
        cat(blout),                         # 6: layer out_fc bias
        row_bin,                            # 7: model in_fc bias
    ], axis=0)                              # [8, L*D]

    return {
        "we1": we1, "we2": we2,
        "be12": jnp.stack([be1, be2], axis=0),          # [2, temb_dim]
        "win": win,
        "wlin": jnp.concatenate(wlin, axis=1),          # [D, L*D]  lane-dense
        "wproj": jnp.concatenate(wproj, axis=1),        # [temb_dim, L*D]
        "wlout": jnp.concatenate(wlout, axis=1),        # [D, L*D]
        "vecs": vecs,                                   # [8, L*D]  single bias/LN slab
        "wout": wout, "bout": bout[None, :],            # [D, out_dim], [1, out_dim]
    }


def _round_up(n, m):
    return ((n + m - 1) // m) * m


@partial(jax.jit, static_argnames=("base_dim", "block_b", "fuse_temb"))
def _forward_jit(x, t, params, *, base_dim, block_b, fuse_temb):
    B, in_dim = x.shape
    out_dim = params["wout"].shape[1]

    # Batch tiling: TB rows per grid step (multiple of 8 sublanes); pad B up if ragged.
    TB = min(block_b, _round_up(B, 8))
    Bp = _round_up(B, TB)
    if Bp != B:
        x = jnp.pad(x, ((0, Bp - B), (0, 0)))
        t = jnp.pad(t, ((0, Bp - B),))

    if fuse_temb:
        feat = t.astype(jnp.float32).reshape(Bp, 1)      # raw timesteps; sin/cos in-kernel
        feat_spec = pl.BlockSpec((TB, 1), lambda i: (i, 0))
    else:
        feat = get_timestep_embedding(t, base_dim)       # [Bp, base_dim]
        feat_spec = pl.BlockSpec((TB, base_dim), lambda i: (i, 0))

    # Weights: full-array blocks with a constant index_map -> VMEM-resident across the
    # whole grid (DMA'd once), batch tiles pipeline over them.
    resident = lambda a: pl.BlockSpec(a.shape, lambda i: (0, 0))

    w_args = (params["we1"], params["be12"], params["we2"], params["win"],
              params["wproj"], params["wlin"], params["wlout"], params["vecs"],
              params["wout"], params["bout"])

    out = pl.pallas_call(
        _make_kernel(fuse_temb),
        grid=(Bp // TB,),
        in_specs=[pl.BlockSpec((TB, in_dim), lambda i: (i, 0)), feat_spec]
                 + [resident(a) for a in w_args],
        out_specs=pl.BlockSpec((TB, out_dim), lambda i: (i, 0)),
        out_shape=jax.ShapeDtypeStruct((Bp, out_dim), jnp.float32),
        compiler_params=pltpu.CompilerParams(
            dimension_semantics=("parallel",)),          # shard batch tiles across TCs (v7x)
    )(x, feat, *w_args)
    return out[:B]


def conditional_mlp_forward(x, t, params, *, base_dim, block_b=1024):
    try:
        y = _forward_jit(x, t, params, base_dim=base_dim, block_b=block_b, fuse_temb=True)
        jax.block_until_ready(y)
        return y
    except Exception:
        # TODO(synk): if this Mosaic build cannot lower jnp.sin/jnp.cos in-kernel, fall
        # back to computing the sinusoidal embedding outside the kernel (same semantics).
        y = _forward_jit(x, t, params, base_dim=base_dim, block_b=block_b, fuse_temb=False)
        jax.block_until_ready(y)
        return y


# ---------------------------------------------------------------------------
# Pure-JAX reference (mirrors the PyTorch forward) for a correctness check.
# ---------------------------------------------------------------------------
def reference_forward(x, t, p, base_dim):
    lrelu = lambda v: jnp.where(v >= 0, v, NEG_SLOPE * v)

    def ln(v, g, b):
        mu = jnp.mean(v, axis=-1, keepdims=True)
        var = jnp.mean((v - mu) ** 2, axis=-1, keepdims=True)
        return (v - mu) / jnp.sqrt(var + LN_EPS) * g + b

    D = base_dim
    vecs = p["vecs"]
    L = p["wlin"].shape[1] // D

    temb0 = get_timestep_embedding(t, D)
    t_emb = lrelu(temb0 @ p["we1"] + p["be12"][0:1]) @ p["we2"] + p["be12"][1:2]
    t_act = lrelu(t_emb)

    out = x @ p["win"] + vecs[7:8, :D]
    for i in range(L):
        c0, c1 = i * D, (i + 1) * D
        h = lrelu(ln(out, vecs[0:1, c0:c1], vecs[1:2, c0:c1]))
        h = h @ p["wlin"][:, c0:c1] + vecs[2:3, c0:c1]
        h = h + t_act @ p["wproj"][:, c0:c1] + vecs[3:4, c0:c1]
        h = lrelu(ln(h, vecs[4:5, c0:c1], vecs[5:6, c0:c1]))
        out = h @ p["wlout"][:, c0:c1] + vecs[6:7, c0:c1]
    return lrelu(out) @ p["wout"] + p["bout"]


if __name__ == "__main__":
    B, in_dim, base_dim, num_layers = 8, 4, 32, 3
    temb_dim = 4 * base_dim
    out_dim = in_dim

    key = jax.random.PRNGKey(0)
    kx, kt, kp = jax.random.split(key, 3)
    x = jax.random.normal(kx, (B, in_dim), jnp.float32)
    t = jax.random.randint(kt, (B,), 0, 1000).astype(jnp.float32)  # discrete timesteps
    params = init_params(kp, in_dim, base_dim, temb_dim, num_layers, out_dim)

    y = conditional_mlp_forward(x, t, params, base_dim=base_dim)
    jax.block_until_ready(y)

    y_ref = reference_forward(x, t, params, base_dim)
    assert y.shape == (B, out_dim)
    max_err = float(jnp.max(jnp.abs(y - y_ref)))
    assert jnp.allclose(y, y_ref, atol=2e-3, rtol=2e-3), f"mismatch vs reference: {max_err}"
    print("KERNEL_OK")
</pallas_src>

<mosaic_0001>
module attributes {stable_mosaic.version = 11 : i64} {
  func.func @kernel(%arg0: i32, %arg1: memref<8x4xf32, #tpu.memory_space<vmem>>, %arg2: memref<8x1xf32, #tpu.memory_space<vmem>>, %arg3: memref<32x128xf32, #tpu.memory_space<vmem>>, %arg4: memref<2x128xf32, #tpu.memory_space<vmem>>, %arg5: memref<128x128xf32, #tpu.memory_space<vmem>>, %arg6: memref<4x32xf32, #tpu.memory_space<vmem>>, %arg7: memref<128x96xf32, #tpu.memory_space<vmem>>, %arg8: memref<32x96xf32, #tpu.memory_space<vmem>>, %arg9: memref<32x96xf32, #tpu.memory_space<vmem>>, %arg10: memref<8x96xf32, #tpu.memory_space<vmem>>, %arg11: memref<32x4xf32, #tpu.memory_space<vmem>>, %arg12: memref<1x4xf32, #tpu.memory_space<vmem>>, %arg13: memref<8x4xf32, #tpu.memory_space<vmem>>) attributes {dimension_semantics = [#tpu.dimension_semantics<parallel>], iteration_bounds = array<i64: 1>, scalar_prefetch = 0 : i64, scratch_operands = 0 : i64, tpu.core_type = #tpu.core_type<tc>, window_params = [{transform_indices = @transform_0, window_bounds = array<i64: 8, 4>}, {transform_indices = @transform_1, window_bounds = array<i64: 8, 1>}, {pipeline_mode = #tpu.pipeline_mode<synchronous>, transform_indices = @transform_2, window_bounds = array<i64: 32, 128>}, {pipeline_mode = #tpu.pipeline_mode<synchronous>, transform_indices = @transform_3, window_bounds = array<i64: 2, 128>}, {pipeline_mode = #tpu.pipeline_mode<synchronous>, transform_indices = @transform_4, window_bounds = array<i64: 128, 128>}, {pipeline_mode = #tpu.pipeline_mode<synchronous>, transform_indices = @transform_5, window_bounds = array<i64: 4, 32>}, {pipeline_mode = #tpu.pipeline_mode<synchronous>, transform_indices = @transform_6, window_bounds = array<i64: 128, 96>}, {pipeline_mode = #tpu.pipeline_mode<synchronous>, transform_indices = @transform_7, window_bounds = array<i64: 32, 96>}, {pipeline_mode = #tpu.pipeline_mode<synchronous>, transform_indices = @transform_8, window_bounds = array<i64: 32, 96>}, {pipeline_mode = #tpu.pipeline_mode<synchronous>, transform_indices = @transform_9, window_bounds = array<i64: 8, 96>}, {pipeline_mode = #tpu.pipeline_mode<synchronous>, transform_indices = @transform_10, window_bounds = array<i64: 32, 4>}, {pipeline_mode = #tpu.pipeline_mode<synchronous>, transform_indices = @transform_11, window_bounds = array<i64: 1, 4>}, {transform_indices = @transform_12, window_bounds = array<i64: 8, 4>}]} {
    %c0 = arith.constant 0 : index
    %c0_0 = arith.constant 0 : index
    %0 = vector.load %arg4[%c0, %c0_0] : memref<2x128xf32, #tpu.memory_space<vmem>>, vector<2x128xf32>
    %c0_1 = arith.constant 0 : index
    %c0_2 = arith.constant 0 : index
    %1 = vector.load %arg10[%c0_1, %c0_2] : memref<8x96xf32, #tpu.memory_space<vmem>>, vector<8x96xf32>
    %c0_3 = arith.constant 0 : index
    %c0_4 = arith.constant 0 : index
    %2 = vector.load %arg8[%c0_3, %c0_4] : memref<32x96xf32, #tpu.memory_space<vmem>>, vector<32x96xf32>
    %c0_5 = arith.constant 0 : index
    %c0_6 = arith.constant 0 : index
    %3 = vector.load %arg9[%c0_5, %c0_6] : memref<32x96xf32, #tpu.memory_space<vmem>>, vector<32x96xf32>
    %4 = tpu.iota {dimensions = array<i32: 1>} : vector<8x32xi32>
    %c16_i32 = arith.constant 16 : i32
    %5 = vector.broadcast %c16_i32 : i32 to vector<8x32xi32>
    %6 = arith.cmpi slt, %4, %5 : vector<8x32xi32>
    %c16_i32_7 = arith.constant 16 : i32
    %7 = vector.broadcast %c16_i32_7 : i32 to vector<8x32xi32>
    %8 = arith.subi %4, %7 : vector<8x32xi32>
    %9 = arith.select %6, %4, %8 : vector<8x32xi1>, vector<8x32xi32>
    %10 = arith.sitofp %9 : vector<8x32xi32> to vector<8x32xf32>
    %cst = arith.constant -9.21034049 : f32
    %11 = vector.broadcast %cst : f32 to vector<8x32xf32>
    %12 = arith.mulf %11, %10 : vector<8x32xf32>
    %cst_8 = arith.constant 1.500000e+01 : f32
    %13 = vector.broadcast %cst_8 : f32 to vector<8x32xf32>
    %14 = arith.divf %12, %13 : vector<8x32xf32>
    %15 = math.exp %14 : vector<8x32xf32>
    %c0_9 = arith.constant 0 : index
    %c0_10 = arith.constant 0 : index
    %16 = vector.load %arg2[%c0_9, %c0_10] : memref<8x1xf32, #tpu.memory_space<vmem>>, vector<8x1xf32>
    %17 = vector.broadcast %16 : vector<8x1xf32> to vector<8x32xf32>
    %18 = arith.mulf %17, %15 : vector<8x32xf32>
    %c16_i32_11 = arith.constant 16 : i32
    %19 = vector.broadcast %c16_i32_11 : i32 to vector<8x32xi32>
    %20 = arith.cmpi slt, %4, %19 : vector<8x32xi32>
    %21 = math.sin %18 : vector<8x32xf32>
    %22 = math.cos %18 : vector<8x32xf32>
    %23 = arith.select %20, %21, %22 : vector<8x32xi1>, vector<8x32xf32>
    %c0_12 = arith.constant 0 : index
    %c0_13 = arith.constant 0 : index
    %24 = vector.load %arg3[%c0_12, %c0_13] : memref<32x128xf32, #tpu.memory_space<vmem>>, vector<32x128xf32>
    %cst_14 = arith.constant dense<0.000000e+00> : vector<8x128xf32>
    %25 = tpu.matmul %23, %24, %cst_14 {dimension_numbers = #tpu.dot_dimension_numbers<[1], [0], [0], [1], [0, 0, 1, 1], [], []>} : vector<8x32xf32>, vector<32x128xf32>, vector<8x128xf32> -> vector<8x128xf32>
    %26 = vector.extract_strided_slice %0 {offsets = [0, 0], sizes = [1, 128], strides = [1, 1]} : vector<2x128xf32> to vector<1x128xf32>
    %27 = vector.broadcast %26 : vector<1x128xf32> to vector<8x128xf32>
    %28 = arith.addf %25, %27 : vector<8x128xf32>
    %cst_15 = arith.constant 0.000000e+00 : f32
    %29 = vector.broadcast %cst_15 : f32 to vector<8x128xf32>
    %30 = arith.cmpf oge, %28, %29 : vector<8x128xf32>
    %cst_16 = arith.constant 2.000000e-02 : f32
    %31 = vector.broadcast %cst_16 : f32 to vector<8x128xf32>
    %32 = arith.mulf %31, %28 : vector<8x128xf32>
    %33 = arith.select %30, %28, %32 : vector<8x128xi1>, vector<8x128xf32>
    %c0_17 = arith.constant 0 : index
    %c0_18 = arith.constant 0 : index
    %34 = vector.load %arg5[%c0_17, %c0_18] : memref<128x128xf32, #tpu.memory_space<vmem>>, vector<128x128xf32>
    %cst_19 = arith.constant dense<0.000000e+00> : vector<8x128xf32>
    %35 = tpu.matmul %33, %34, %cst_19 {dimension_numbers = #tpu.dot_dimension_numbers<[1], [0], [0], [1], [0, 0, 1, 1], [], []>} : vector<8x128xf32>, vector<128x128xf32>, vector<8x128xf32> -> vector<8x128xf32>
    %36 = vector.extract_strided_slice %0 {offsets = [1, 0], sizes = [1, 128], strides = [1, 1]} : vector<2x128xf32> to vector<1x128xf32>
    %37 = vector.broadcast %36 : vector<1x128xf32> to vector<8x128xf32>
    %38 = arith.addf %35, %37 : vector<8x128xf32>
    %cst_20 = arith.constant 0.000000e+00 : f32
    %39 = vector.broadcast %cst_20 : f32 to vector<8x128xf32>
    %40 = arith.cmpf oge, %38, %39 : vector<8x128xf32>
    %cst_21 = arith.constant 2.000000e-02 : f32
    %41 = vector.broadcast %cst_21 : f32 to vector<8x128xf32>
    %42 = arith.mulf %41, %38 : vector<8x128xf32>
    %43 = arith.select %40, %38, %42 : vector<8x128xi1>, vector<8x128xf32>
    %c0_22 = arith.constant 0 : index
    %c0_23 = arith.constant 0 : index
    %44 = vector.load %arg7[%c0_22, %c0_23] : memref<128x96xf32, #tpu.memory_space<vmem>>, vector<128x96xf32>
    %cst_24 = arith.constant dense<0.000000e+00> : vector<8x96xf32>
    %45 = tpu.matmul %43, %44, %cst_24 {dimension_numbers = #tpu.dot_dimension_numbers<[1], [0], [0], [1], [0, 0, 1, 1], [], []>} : vector<8x128xf32>, vector<128x96xf32>, vector<8x96xf32> -> vector<8x96xf32>
    %46 = vector.extract_strided_slice %1 {offsets = [3, 0], sizes = [1, 96], strides = [1, 1]} : vector<8x96xf32> to vector<1x96xf32>
    %47 = vector.broadcast %46 : vector<1x96xf32> to vector<8x96xf32>
    %48 = arith.addf %45, %47 : vector<8x96xf32>
    %c0_25 = arith.constant 0 : index
    %c0_26 = arith.constant 0 : index
    %49 = vector.load %arg1[%c0_25, %c0_26] : memref<8x4xf32, #tpu.memory_space<vmem>>, vector<8x4xf32>
    %c0_27 = arith.constant 0 : index
    %c0_28 = arith.constant 0 : index
    %50 = vector.load %arg6[%c0_27, %c0_28] : memref<4x32xf32, #tpu.memory_space<vmem>>, vector<4x32xf32>
    %cst_29 = arith.constant dense<0.000000e+00> : vector<8x32xf32>
    %51 = tpu.matmul %49, %50, %cst_29 {dimension_numbers = #tpu.dot_dimension_numbers<[1], [0], [0], [1], [0, 0, 1, 1], [], []>} : vector<8x4xf32>, vector<4x32xf32>, vector<8x32xf32> -> vector<8x32xf32>
    %52 = vector.extract_strided_slice %1 {offsets = [7, 0], sizes = [1, 32], strides = [1, 1]} : vector<8x96xf32> to vector<1x32xf32>
    %53 = vector.broadcast %52 : vector<1x32xf32> to vector<8x32xf32>
    %54 = arith.addf %51, %53 : vector<8x32xf32>
    %55 = vector.extract_strided_slice %1 {offsets = [0, 0], sizes = [1, 32], strides = [1, 1]} : vector<8x96xf32> to vector<1x32xf32>
    %56 = vector.extract_strided_slice %1 {offsets = [1, 0], sizes = [1, 32], strides = [1, 1]} : vector<8x96xf32> to vector<1x32xf32>
    %cst_30 = arith.constant dense<0.000000e+00> : vector<8xf32>
    %57 = vector.multi_reduction <add>, %54, %cst_30 [1] : vector<8x32xf32> to vector<8xf32>
    %58 = vector.shape_cast %57 : vector<8xf32> to vector<8x1xf32>
    %cst_31 = arith.constant 3.200000e+01 : f32
    %59 = vector.broadcast %cst_31 : f32 to vector<8x1xf32>
    %60 = arith.divf %58, %59 : vector<8x1xf32>
    %61 = vector.broadcast %60 : vector<8x1xf32> to vector<8x32xf32>
    %62 = arith.subf %54, %61 : vector<8x32xf32>
    %63 = arith.mulf %62, %62 : vector<8x32xf32>
    %cst_32 = arith.constant dense<0.000000e+00> : vector<8xf32>
    %64 = vector.multi_reduction <add>, %63, %cst_32 [1] : vector<8x32xf32> to vector<8xf32>
    %65 = vector.shape_cast %64 : vector<8xf32> to vector<8x1xf32>
    %cst_33 = arith.constant 3.200000e+01 : f32
    %66 = vector.broadcast %cst_33 : f32 to vector<8x1xf32>
    %67 = arith.divf %65, %66 : vector<8x1xf32>
    %cst_34 = arith.constant 9.99999974E-6 : f32
    %68 = vector.broadcast %cst_34 : f32 to vector<8x1xf32>
    %69 = arith.addf %67, %68 : vector<8x1xf32>
    %70 = math.rsqrt %69 : vector<8x1xf32>
    %71 = vector.broadcast %70 : vector<8x1xf32> to vector<8x32xf32>
    %72 = arith.mulf %62, %71 : vector<8x32xf32>
    %73 = vector.broadcast %55 : vector<1x32xf32> to vector<8x32xf32>
    %74 = arith.mulf %72, %73 : vector<8x32xf32>
    %75 = vector.broadcast %56 : vector<1x32xf32> to vector<8x32xf32>
    %76 = arith.addf %74, %75 : vector<8x32xf32>
    %cst_35 = arith.constant 0.000000e+00 : f32
    %77 = vector.broadcast %cst_35 : f32 to vector<8x32xf32>
    %78 = arith.cmpf oge, %76, %77 : vector<8x32xf32>
    %cst_36 = arith.constant 2.000000e-02 : f32
    %79 = vector.broadcast %cst_36 : f32 to vector<8x32xf32>
    %80 = arith.mulf %79, %76 : vector<8x32xf32>
    %81 = arith.select %78, %76, %80 : vector<8x32xi1>, vector<8x32xf32>
    %82 = vector.extract_strided_slice %2 {offsets = [0, 0], sizes = [32, 32], strides = [1, 1]} : vector<32x96xf32> to vector<32x32xf32>
    %cst_37 = arith.constant dense<0.000000e+00> : vector<8x32xf32>
    %83 = tpu.matmul %81, %82, %cst_37 {dimension_numbers = #tpu.dot_dimension_numbers<[1], [0], [0], [1], [0, 0, 1, 1], [], []>} : vector<8x32xf32>, vector<32x32xf32>, vector<8x32xf32> -> vector<8x32xf32>
    %84 = vector.extract_strided_slice %1 {offsets = [2, 0], sizes = [1, 32], strides = [1, 1]} : vector<8x96xf32> to vector<1x32xf32>
    %85 = vector.broadcast %84 : vector<1x32xf32> to vector<8x32xf32>
    %86 = arith.addf %83, %85 : vector<8x32xf32>
    %87 = vector.extract_strided_slice %48 {offsets = [0, 0], sizes = [8, 32], strides = [1, 1]} : vector<8x96xf32> to vector<8x32xf32>
    %88 = arith.addf %86, %87 : vector<8x32xf32>
    %89 = vector.extract_strided_slice %1 {offsets = [4, 0], sizes = [1, 32], strides = [1, 1]} : vector<8x96xf32> to vector<1x32xf32>
    %90 = vector.extract_strided_slice %1 {offsets = [5, 0], sizes = [1, 32], strides = [1, 1]} : vector<8x96xf32> to vector<1x32xf32>
    %cst_38 = arith.constant dense<0.000000e+00> : vector<8xf32>
    %91 = vector.multi_reduction <add>, %88, %cst_38 [1] : vector<8x32xf32> to vector<8xf32>
    %92 = vector.shape_cast %91 : vector<8xf32> to vector<8x1xf32>
    %cst_39 = arith.constant 3.200000e+01 : f32
    %93 = vector.broadcast %cst_39 : f32 to vector<8x1xf32>
    %94 = arith.divf %92, %93 : vector<8x1xf32>
    %95 = vector.broadcast %94 : vector<8x1xf32> to vector<8x32xf32>
    %96 = arith.subf %88, %95 : vector<8x32xf32>
    %97 = arith.mulf %96, %96 : vector<8x32xf32>
    %cst_40 = arith.constant dense<0.000000e+00> : vector<8xf32>
    %98 = vector.multi_reduction <add>, %97, %cst_40 [1] : vector<8x32xf32> to vector<8xf32>
    %99 = vector.shape_cast %98 : vector<8xf32> to vector<8x1xf32>
    %cst_41 = arith.constant 3.200000e+01 : f32
    %100 = vector.broadcast %cst_41 : f32 to vector<8x1xf32>
    %101 = arith.divf %99, %100 : vector<8x1xf32>
    %cst_42 = arith.constant 9.99999974E-6 : f32
    %102 = vector.broadcast %cst_42 : f32 to vector<8x1xf32>
    %103 = arith.addf %101, %102 : vector<8x1xf32>
    %104 = math.rsqrt %103 : vector<8x1xf32>
    %105 = vector.broadcast %104 : vector<8x1xf32> to vector<8x32xf32>
    %106 = arith.mulf %96, %105 : vector<8x32xf32>
    %107 = vector.broadcast %89 : vector<1x32xf32> to vector<8x32xf32>
    %108 = arith.mulf %106, %107 : vector<8x32xf32>
    %109 = vector.broadcast %90 : vector<1x32xf32> to vector<8x32xf32>
    %110 = arith.addf %108, %109 : vector<8x32xf32>
    %cst_43 = arith.constant 0.000000e+00 : f32
    %111 = vector.broadcast %cst_43 : f32 to vector<8x32xf32>
    %112 = arith.cmpf oge, %110, %111 : vector<8x32xf32>
    %cst_44 = arith.constant 2.000000e-02 : f32
    %113 = vector.broadcast %cst_44 : f32 to vector<8x32xf32>
    %114 = arith.mulf %113, %110 : vector<8x32xf32>
    %115 = arith.select %112, %110, %114 : vector<8x32xi1>, vector<8x32xf32>
    %116 = vector.extract_strided_slice %3 {offsets = [0, 0], sizes = [32, 32], strides = [1, 1]} : vector<32x96xf32> to vector<32x32xf32>
    %cst_45 = arith.constant dense<0.000000e+00> : vector<8x32xf32>
    %117 = tpu.matmul %115, %116, %cst_45 {dimension_numbers = #tpu.dot_dimension_numbers<[1], [0], [0], [1], [0, 0, 1, 1], [], []>} : vector<8x32xf32>, vector<32x32xf32>, vector<8x32xf32> -> vector<8x32xf32>
    %118 = vector.extract_strided_slice %1 {offsets = [6, 0], sizes = [1, 32], strides = [1, 1]} : vector<8x96xf32> to vector<1x32xf32>
    %119 = vector.broadcast %118 : vector<1x32xf32> to vector<8x32xf32>
    %120 = arith.addf %117, %119 : vector<8x32xf32>
    %121 = vector.extract_strided_slice %1 {offsets = [0, 32], sizes = [1, 32], strides = [1, 1]} : vector<8x96xf32> to vector<1x32xf32>
    %122 = vector.extract_strided_slice %1 {offsets = [1, 32], sizes = [1, 32], strides = [1, 1]} : vector<8x96xf32> to vector<1x32xf32>
    %cst_46 = arith.constant dense<0.000000e+00> : vector<8xf32>
    %123 = vector.multi_reduction <add>, %120, %cst_46 [1] : vector<8x32xf32> to vector<8xf32>
    %124 = vector.shape_cast %123 : vector<8xf32> to vector<8x1xf32>
    %cst_47 = arith.constant 3.200000e+01 : f32
    %125 = vector.broadcast %cst_47 : f32 to vector<8x1xf32>
    %126 = arith.divf %124, %125 : vector<8x1xf32>
    %127 = vector.broadcast %126 : vector<8x1xf32> to vector<8x32xf32>
    %128 = arith.subf %120, %127 : vector<8x32xf32>
    %129 = arith.mulf %128, %128 : vector<8x32xf32>
    %cst_48 = arith.constant dense<0.000000e+00> : vector<8xf32>
    %130 = vector.multi_reduction <add>, %129, %cst_48 [1] : vector<8x32xf32> to vector<8xf32>
    %131 = vector.shape_cast %130 : vector<8xf32> to vector<8x1xf32>
    %cst_49 = arith.constant 3.200000e+01 : f32
    %132 = vector.broadcast %cst_49 : f32 to vector<8x1xf32>
    %133 = arith.divf %131, %132 : vector<8x1xf32>
    %cst_50 = arith.constant 9.99999974E-6 : f32
    %134 = vector.broadcast %cst_50 : f32 to vector<8x1xf32>
    %135 = arith.addf %133, %134 : vector<8x1xf32>
    %136 = math.rsqrt %135 : vector<8x1xf32>
    %137 = vector.broadcast %136 : vector<8x1xf32> to vector<8x32xf32>
    %138 = arith.mulf %128, %137 : vector<8x32xf32>
    %139 = vector.broadcast %121 : vector<1x32xf32> to vector<8x32xf32>
    %140 = arith.mulf %138, %139 : vector<8x32xf32>
    %141 = vector.broadcast %122 : vector<1x32xf32> to vector<8x32xf32>
    %142 = arith.addf %140, %141 : vector<8x32xf32>
    %cst_51 = arith.constant 0.000000e+00 : f32
    %143 = vector.broadcast %cst_51 : f32 to vector<8x32xf32>
    %144 = arith.cmpf oge, %142, %143 : vector<8x32xf32>
    %cst_52 = arith.constant 2.000000e-02 : f32
    %145 = vector.broadcast %cst_52 : f32 to vector<8x32xf32>
    %146 = arith.mulf %145, %142 : vector<8x32xf32>
    %147 = arith.select %144, %142, %146 : vector<8x32xi1>, vector<8x32xf32>
    %148 = vector.extract_strided_slice %2 {offsets = [0, 32], sizes = [32, 32], strides = [1, 1]} : vector<32x96xf32> to vector<32x32xf32>
    %cst_53 = arith.constant dense<0.000000e+00> : vector<8x32xf32>
    %149 = tpu.matmul %147, %148, %cst_53 {dimension_numbers = #tpu.dot_dimension_numbers<[1], [0], [0], [1], [0, 0, 1, 1], [], []>} : vector<8x32xf32>, vector<32x32xf32>, vector<8x32xf32> -> vector<8x32xf32>
    %150 = vector.extract_strided_slice %1 {offsets = [2, 32], sizes = [1, 32], strides = [1, 1]} : vector<8x96xf32> to vector<1x32xf32>
    %151 = vector.broadcast %150 : vector<1x32xf32> to vector<8x32xf32>
    %152 = arith.addf %149, %151 : vector<8x32xf32>
    %153 = vector.extract_strided_slice %48 {offsets = [0, 32], sizes = [8, 32], strides = [1, 1]} : vector<8x96xf32> to vector<8x32xf32>
    %154 = arith.addf %152, %153 : vector<8x32xf32>
    %155 = vector.extract_strided_slice %1 {offsets = [4, 32], sizes = [1, 32], strides = [1, 1]} : vector<8x96xf32> to vector<1x32xf32>
    %156 = vector.extract_strided_slice %1 {offsets = [5, 32], sizes = [1, 32], strides = [1, 1]} : vector<8x96xf32> to vector<1x32xf32>
    %cst_54 = arith.constant dense<0.000000e+00> : vector<8xf32>
    %157 = vector.multi_reduction <add>, %154, %cst_54 [1] : vector<8x32xf32> to vector<8xf32>
    %158 = vector.shape_cast %157 : vector<8xf32> to vector<8x1xf32>
    %cst_55 = arith.constant 3.200000e+01 : f32
    %159 = vector.broadcast %cst_55 : f32 to vector<8x1xf32>
    %160 = arith.divf %158, %159 : vector<8x1xf32>
    %161 = vector.broadcast %160 : vector<8x1xf32> to vector<8x32xf32>
    %162 = arith.subf %154, %161 : vector<8x32xf32>
    %163 = arith.mulf %162, %162 : vector<8x32xf32>
    %cst_56 = arith.constant dense<0.000000e+00> : vector<8xf32>
    %164 = vector.multi_reduction <add>, %163, %cst_56 [1] : vector<8x32xf32> to vector<8xf32>
    %165 = vector.shape_cast %164 : vector<8xf32> to vector<8x1xf32>
    %cst_57 = arith.constant 3.200000e+01 : f32
    %166 = vector.broadcast %cst_57 : f32 to vector<8x1xf32>
    %167 = arith.divf %165, %166 : vector<8x1xf32>
    %cst_58 = arith.constant 9.99999974E-6 : f32
    %168 = vector.broadcast %cst_58 : f32 to vector<8x1xf32>
    %169 = arith.addf %167, %168 : vector<8x1xf32>
    %170 = math.rsqrt %169 : vector<8x1xf32>
    %171 = vector.broadcast %170 : vector<8x1xf32> to vector<8x32xf32>
    %172 = arith.mulf %162, %171 : vector<8x32xf32>
    %173 = vector.broadcast %155 : vector<1x32xf32> to vector<8x32xf32>
    %174 = arith.mulf %172, %173 : vector<8x32xf32>
    %175 = vector.broadcast %156 : vector<1x32xf32> to vector<8x32xf32>
    %176 = arith.addf %174, %175 : vector<8x32xf32>
    %cst_59 = arith.constant 0.000000e+00 : f32
    %177 = vector.broadcast %cst_59 : f32 to vector<8x32xf32>
    %178 = arith.cmpf oge, %176, %177 : vector<8x32xf32>
    %cst_60 = arith.constant 2.000000e-02 : f32
    %179 = vector.broadcast %cst_60 : f32 to vector<8x32xf32>
    %180 = arith.mulf %179, %176 : vector<8x32xf32>
    %181 = arith.select %178, %176, %180 : vector<8x32xi1>, vector<8x32xf32>
    %182 = vector.extract_strided_slice %3 {offsets = [0, 32], sizes = [32, 32], strides = [1, 1]} : vector<32x96xf32> to vector<32x32xf32>
    %cst_61 = arith.constant dense<0.000000e+00> : vector<8x32xf32>
    %183 = tpu.matmul %181, %182, %cst_61 {dimension_numbers = #tpu.dot_dimension_numbers<[1], [0], [0], [1], [0, 0, 1, 1], [], []>} : vector<8x32xf32>, vector<32x32xf32>, vector<8x32xf32> -> vector<8x32xf32>
    %184 = vector.extract_strided_slice %1 {offsets = [6, 32], sizes = [1, 32], strides = [1, 1]} : vector<8x96xf32> to vector<1x32xf32>
    %185 = vector.broadcast %184 : vector<1x32xf32> to vector<8x32xf32>
    %186 = arith.addf %183, %185 : vector<8x32xf32>
    %187 = vector.extract_strided_slice %1 {offsets = [0, 64], sizes = [1, 32], strides = [1, 1]} : vector<8x96xf32> to vector<1x32xf32>
    %188 = vector.extract_strided_slice %1 {offsets = [1, 64], sizes = [1, 32], strides = [1, 1]} : vector<8x96xf32> to vector<1x32xf32>
    %cst_62 = arith.constant dense<0.000000e+00> : vector<8xf32>
    %189 = vector.multi_reduction <add>, %186, %cst_62 [1] : vector<8x32xf32> to vector<8xf32>
    %190 = vector.shape_cast %189 : vector<8xf32> to vector<8x1xf32>
    %cst_63 = arith.constant 3.200000e+01 : f32
    %191 = vector.broadcast %cst_63 : f32 to vector<8x1xf32>
    %192 = arith.divf %190, %191 : vector<8x1xf32>
    %193 = vector.broadcast %192 : vector<8x1xf32> to vector<8x32xf32>
    %194 = arith.subf %186, %193 : vector<8x32xf32>
    %195 = arith.mulf %194, %194 : vector<8x32xf32>
    %cst_64 = arith.constant dense<0.000000e+00> : vector<8xf32>
    %196 = vector.multi_reduction <add>, %195, %cst_64 [1] : vector<8x32xf32> to vector<8xf32>
    %197 = vector.shape_cast %196 : vector<8xf32> to vector<8x1xf32>
    %cst_65 = arith.constant 3.200000e+01 : f32
    %198 = vector.broadcast %cst_65 : f32 to vector<8x1xf32>
    %199 = arith.divf %197, %198 : vector<8x1xf32>
    %cst_66 = arith.constant 9.99999974E-6 : f32
    %200 = vector.broadcast %cst_66 : f32 to vector<8x1xf32>
    %201 = arith.addf %199, %200 : vector<8x1xf32>
    %202 = math.rsqrt %201 : vector<8x1xf32>
    %203 = vector.broadcast %202 : vector<8x1xf32> to vector<8x32xf32>
    %204 = arith.mulf %194, %203 : vector<8x32xf32>
    %205 = vector.broadcast %187 : vector<1x32xf32> to vector<8x32xf32>
    %206 = arith.mulf %204, %205 : vector<8x32xf32>
    %207 = vector.broadcast %188 : vector<1x32xf32> to vector<8x32xf32>
    %208 = arith.addf %206, %207 : vector<8x32xf32>
    %cst_67 = arith.constant 0.000000e+00 : f32
    %209 = vector.broadcast %cst_67 : f32 to vector<8x32xf32>
    %210 = arith.cmpf oge, %208, %209 : vector<8x32xf32>
    %cst_68 = arith.constant 2.000000e-02 : f32
    %211 = vector.broadcast %cst_68 : f32 to vector<8x32xf32>
    %212 = arith.mulf %211, %208 : vector<8x32xf32>
    %213 = arith.select %210, %208, %212 : vector<8x32xi1>, vector<8x32xf32>
    %214 = vector.extract_strided_slice %2 {offsets = [0, 64], sizes = [32, 32], strides = [1, 1]} : vector<32x96xf32> to vector<32x32xf32>
    %cst_69 = arith.constant dense<0.000000e+00> : vector<8x32xf32>
    %215 = tpu.matmul %213, %214, %cst_69 {dimension_numbers = #tpu.dot_dimension_numbers<[1], [0], [0], [1], [0, 0, 1, 1], [], []>} : vector<8x32xf32>, vector<32x32xf32>, vector<8x32xf32> -> vector<8x32xf32>
    %216 = vector.extract_strided_slice %1 {offsets = [2, 64], sizes = [1, 32], strides = [1, 1]} : vector<8x96xf32> to vector<1x32xf32>
    %217 = vector.broadcast %216 : vector<1x32xf32> to vector<8x32xf32>
    %218 = arith.addf %215, %217 : vector<8x32xf32>
    %219 = vector.extract_strided_slice %48 {offsets = [0, 64], sizes = [8, 32], strides = [1, 1]} : vector<8x96xf32> to vector<8x32xf32>
    %220 = arith.addf %218, %219 : vector<8x32xf32>
    %221 = vector.extract_strided_slice %1 {offsets = [4, 64], sizes = [1, 32], strides = [1, 1]} : vector<8x96xf32> to vector<1x32xf32>
    %222 = vector.extract_strided_slice %1 {offsets = [5, 64], sizes = [1, 32], strides = [1, 1]} : vector<8x96xf32> to vector<1x32xf32>
    %cst_70 = arith.constant dense<0.000000e+00> : vector<8xf32>
    %223 = vector.multi_reduction <add>, %220, %cst_70 [1] : vector<8x32xf32> to vector<8xf32>
    %224 = vector.shape_cast %223 : vector<8xf32> to vector<8x1xf32>
    %cst_71 = arith.constant 3.200000e+01 : f32
    %225 = vector.broadcast %cst_71 : f32 to vector<8x1xf32>
    %226 = arith.divf %224, %225 : vector<8x1xf32>
    %227 = vector.broadcast %226 : vector<8x1xf32> to vector<8x32xf32>
    %228 = arith.subf %220, %227 : vector<8x32xf32>
    %229 = arith.mulf %228, %228 : vector<8x32xf32>
    %cst_72 = arith.constant dense<0.000000e+00> : vector<8xf32>
    %230 = vector.multi_reduction <add>, %229, %cst_72 [1] : vector<8x32xf32> to vector<8xf32>
    %231 = vector.shape_cast %230 : vector<8xf32> to vector<8x1xf32>
    %cst_73 = arith.constant 3.200000e+01 : f32
    %232 = vector.broadcast %cst_73 : f32 to vector<8x1xf32>
    %233 = arith.divf %231, %232 : vector<8x1xf32>
    %cst_74 = arith.constant 9.99999974E-6 : f32
    %234 = vector.broadcast %cst_74 : f32 to vector<8x1xf32>
    %235 = arith.addf %233, %234 : vector<8x1xf32>
    %236 = math.rsqrt %235 : vector<8x1xf32>
    %237 = vector.broadcast %236 : vector<8x1xf32> to vector<8x32xf32>
    %238 = arith.mulf %228, %237 : vector<8x32xf32>
    %239 = vector.broadcast %221 : vector<1x32xf32> to vector<8x32xf32>
    %240 = arith.mulf %238, %239 : vector<8x32xf32>
    %241 = vector.broadcast %222 : vector<1x32xf32> to vector<8x32xf32>
    %242 = arith.addf %240, %241 : vector<8x32xf32>
    %cst_75 = arith.constant 0.000000e+00 : f32
    %243 = vector.broadcast %cst_75 : f32 to vector<8x32xf32>
    %244 = arith.cmpf oge, %242, %243 : vector<8x32xf32>
    %cst_76 = arith.constant 2.000000e-02 : f32
    %245 = vector.broadcast %cst_76 : f32 to vector<8x32xf32>
    %246 = arith.mulf %245, %242 : vector<8x32xf32>
    %247 = arith.select %244, %242, %246 : vector<8x32xi1>, vector<8x32xf32>
    %248 = vector.extract_strided_slice %3 {offsets = [0, 64], sizes = [32, 32], strides = [1, 1]} : vector<32x96xf32> to vector<32x32xf32>
    %cst_77 = arith.constant dense<0.000000e+00> : vector<8x32xf32>
    %249 = tpu.matmul %247, %248, %cst_77 {dimension_numbers = #tpu.dot_dimension_numbers<[1], [0], [0], [1], [0, 0, 1, 1], [], []>} : vector<8x32xf32>, vector<32x32xf32>, vector<8x32xf32> -> vector<8x32xf32>
    %250 = vector.extract_strided_slice %1 {offsets = [6, 64], sizes = [1, 32], strides = [1, 1]} : vector<8x96xf32> to vector<1x32xf32>
    %251 = vector.broadcast %250 : vector<1x32xf32> to vector<8x32xf32>
    %252 = arith.addf %249, %251 : vector<8x32xf32>
    %cst_78 = arith.constant 0.000000e+00 : f32
    %253 = vector.broadcast %cst_78 : f32 to vector<8x32xf32>
    %254 = arith.cmpf oge, %252, %253 : vector<8x32xf32>
    %cst_79 = arith.constant 2.000000e-02 : f32
    %255 = vector.broadcast %cst_79 : f32 to vector<8x32xf32>
    %256 = arith.mulf %255, %252 : vector<8x32xf32>
    %257 = arith.select %254, %252, %256 : vector<8x32xi1>, vector<8x32xf32>
    %c0_80 = arith.constant 0 : index
    %c0_81 = arith.constant 0 : index
    %258 = vector.load %arg11[%c0_80, %c0_81] : memref<32x4xf32, #tpu.memory_space<vmem>>, vector<32x4xf32>
    %cst_82 = arith.constant dense<0.000000e+00> : vector<8x4xf32>
    %259 = tpu.matmul %257, %258, %cst_82 {dimension_numbers = #tpu.dot_dimension_numbers<[1], [0], [0], [1], [0, 0, 1, 1], [], []>} : vector<8x32xf32>, vector<32x4xf32>, vector<8x4xf32> -> vector<8x4xf32>
    %c0_83 = arith.constant 0 : index
    %c0_84 = arith.constant 0 : index
    %260 = vector.load %arg12[%c0_83, %c0_84] : memref<1x4xf32, #tpu.memory_space<vmem>>, vector<1x4xf32>
    %261 = vector.broadcast %260 : vector<1x4xf32> to vector<8x4xf32>
    %262 = arith.addf %259, %261 : vector<8x4xf32>
    %c0_85 = arith.constant 0 : index
    %c0_86 = arith.constant 0 : index
    %263 = vector.load %arg13[%c0_85, %c0_86] : memref<8x4xf32, #tpu.memory_space<vmem>>, vector<8x4xf32>
    tpu.vector_store %arg13[%c0_85, %c0_86], %262 {strides = array<i32>} : memref<8x4xf32, #tpu.memory_space<vmem>>, vector<8x4xf32>,
    return
  }
  func.func @transform_0(%arg0: i32) -> (i32, i32) {
    %c0_i32 = arith.constant 0 : i32
    %c0_i32_0 = arith.constant 0 : i32
    return %arg0, %c0_i32 : i32, i32
  }
  func.func @transform_1(%arg0: i32) -> (i32, i32) {
    %c0_i32 = arith.constant 0 : i32
    %c0_i32_0 = arith.constant 0 : i32
    return %arg0, %c0_i32 : i32, i32
  }
  func.func @transform_2(%arg0: i32) -> (i32, i32) {
    %c0_i32 = arith.constant 0 : i32
    %c0_i32_0 = arith.constant 0 : i32
    %c0_i32_1 = arith.constant 0 : i32
    return %c0_i32, %c0_i32_0 : i32, i32
  }
  func.func @transform_3(%arg0: i32) -> (i32, i32) {
    %c0_i32 = arith.constant 0 : i32
    %c0_i32_0 = arith.constant 0 : i32
    %c0_i32_1 = arith.constant 0 : i32
    return %c0_i32, %c0_i32_0 : i32, i32
  }
  func.func @transform_4(%arg0: i32) -> (i32, i32) {
    %c0_i32 = arith.constant 0 : i32
    %c0_i32_0 = arith.constant 0 : i32
    %c0_i32_1 = arith.constant 0 : i32
    return %c0_i32, %c0_i32_0 : i32, i32
  }
  func.func @transform_5(%arg0: i32) -> (i32, i32) {
    %c0_i32 = arith.constant 0 : i32
    %c0_i32_0 = arith.constant 0 : i32
    %c0_i32_1 = arith.constant 0 : i32
    return %c0_i32, %c0_i32_0 : i32, i32
  }
  func.func @transform_6(%arg0: i32) -> (i32, i32) {
    %c0_i32 = arith.constant 0 : i32
    %c0_i32_0 = arith.constant 0 : i32
    %c0_i32_1 = arith.constant 0 : i32
    return %c0_i32, %c0_i32_0 : i32, i32
  }
  func.func @transform_7(%arg0: i32) -> (i32, i32) {
    %c0_i32 = arith.constant 0 : i32
    %c0_i32_0 = arith.constant 0 : i32
    %c0_i32_1 = arith.constant 0 : i32
    return %c0_i32, %c0_i32_0 : i32, i32
  }
  func.func @transform_8(%arg0: i32) -> (i32, i32) {
    %c0_i32 = arith.constant 0 : i32
    %c0_i32_0 = arith.constant 0 : i32
    %c0_i32_1 = arith.constant 0 : i32
    return %c0_i32, %c0_i32_0 : i32, i32
  }
  func.func @transform_9(%arg0: i32) -> (i32, i32) {
    %c0_i32 = arith.constant 0 : i32
    %c0_i32_0 = arith.constant 0 : i32
    %c0_i32_1 = arith.constant 0 : i32
    return %c0_i32, %c0_i32_0 : i32, i32
  }
  func.func @transform_10(%arg0: i32) -> (i32, i32) {
    %c0_i32 = arith.constant 0 : i32
    %c0_i32_0 = arith.constant 0 : i32
    %c0_i32_1 = arith.constant 0 : i32
    return %c0_i32, %c0_i32_0 : i32, i32
  }
  func.func @transform_11(%arg0: i32) -> (i32, i32) {
    %c0_i32 = arith.constant 0 : i32
    %c0_i32_0 = arith.constant 0 : i32
    %c0_i32_1 = arith.constant 0 : i32
    return %c0_i32, %c0_i32_0 : i32, i32
  }
  func.func @transform_12(%arg0: i32) -> (i32, i32) {
    %c0_i32 = arith.constant 0 : i32
    %c0_i32_0 = arith.constant 0 : i32
    return %arg0, %c0_i32 : i32, i32
  }
}

module attributes {stable_mosaic.version = 11 : i64} {
  func.func @kernel(%arg0: i32, %arg1: memref<8x4xf32, #tpu.memory_space<vmem>>, %arg2: memref<8x32xf32, #tpu.memory_space<vmem>>, %arg3: memref<32x128xf32, #tpu.memory_space<vmem>>, %arg4: memref<2x128xf32, #tpu.memory_space<vmem>>, %arg5: memref<128x128xf32, #tpu.memory_space<vmem>>, %arg6: memref<4x32xf32, #tpu.memory_space<vmem>>, %arg7: memref<128x96xf32, #tpu.memory_space<vmem>>, %arg8: memref<32x96xf32, #tpu.memory_space<vmem>>, %arg9: memref<32x96xf32, #tpu.memory_space<vmem>>, %arg10: memref<8x96xf32, #tpu.memory_space<vmem>>, %arg11: memref<32x4xf32, #tpu.memory_space<vmem>>, %arg12: memref<1x4xf32, #tpu.memory_space<vmem>>, %arg13: memref<8x4xf32, #tpu.memory_space<vmem>>) attributes {dimension_semantics = [#tpu.dimension_semantics<parallel>], iteration_bounds = array<i64: 1>, scalar_prefetch = 0 : i64, scratch_operands = 0 : i64, tpu.core_type = #tpu.core_type<tc>, window_params = [{transform_indices = @transform_0, window_bounds = array<i64: 8, 4>}, {transform_indices = @transform_1, window_bounds = array<i64: 8, 32>}, {pipeline_mode = #tpu.pipeline_mode<synchronous>, transform_indices = @transform_2, window_bounds = array<i64: 32, 128>}, {pipeline_mode = #tpu.pipeline_mode<synchronous>, transform_indices = @transform_3, window_bounds = array<i64: 2, 128>}, {pipeline_mode = #tpu.pipeline_mode<synchronous>, transform_indices = @transform_4, window_bounds = array<i64: 128, 128>}, {pipeline_mode = #tpu.pipeline_mode<synchronous>, transform_indices = @transform_5, window_bounds = array<i64: 4, 32>}, {pipeline_mode = #tpu.pipeline_mode<synchronous>, transform_indices = @transform_6, window_bounds = array<i64: 128, 96>}, {pipeline_mode = #tpu.pipeline_mode<synchronous>, transform_indices = @transform_7, window_bounds = array<i64: 32, 96>}, {pipeline_mode = #tpu.pipeline_mode<synchronous>, transform_indices = @transform_8, window_bounds = array<i64: 32, 96>}, {pipeline_mode = #tpu.pipeline_mode<synchronous>, transform_indices = @transform_9, window_bounds = array<i64: 8, 96>}, {pipeline_mode = #tpu.pipeline_mode<synchronous>, transform_indices = @transform_10, window_bounds = array<i64: 32, 4>}, {pipeline_mode = #tpu.pipeline_mode<synchronous>, transform_indices = @transform_11, window_bounds = array<i64: 1, 4>}, {transform_indices = @transform_12, window_bounds = array<i64: 8, 4>}]} {
    %c0 = arith.constant 0 : index
    %c0_0 = arith.constant 0 : index
    %0 = vector.load %arg4[%c0, %c0_0] : memref<2x128xf32, #tpu.memory_space<vmem>>, vector<2x128xf32>
    %c0_1 = arith.constant 0 : index
    %c0_2 = arith.constant 0 : index
    %1 = vector.load %arg10[%c0_1, %c0_2] : memref<8x96xf32, #tpu.memory_space<vmem>>, vector<8x96xf32>
    %c0_3 = arith.constant 0 : index
    %c0_4 = arith.constant 0 : index
    %2 = vector.load %arg8[%c0_3, %c0_4] : memref<32x96xf32, #tpu.memory_space<vmem>>, vector<32x96xf32>
    %c0_5 = arith.constant 0 : index
    %c0_6 = arith.constant 0 : index
    %3 = vector.load %arg9[%c0_5, %c0_6] : memref<32x96xf32, #tpu.memory_space<vmem>>, vector<32x96xf32>
    %c0_7 = arith.constant 0 : index
    %c0_8 = arith.constant 0 : index
    %4 = vector.load %arg2[%c0_7, %c0_8] : memref<8x32xf32, #tpu.memory_space<vmem>>, vector<8x32xf32>
    %c0_9 = arith.constant 0 : index
    %c0_10 = arith.constant 0 : index
    %5 = vector.load %arg3[%c0_9, %c0_10] : memref<32x128xf32, #tpu.memory_space<vmem>>, vector<32x128xf32>
    %cst = arith.constant dense<0.000000e+00> : vector<8x128xf32>
    %6 = tpu.matmul %4, %5, %cst {dimension_numbers = #tpu.dot_dimension_numbers<[1], [0], [0], [1], [0, 0, 1, 1], [], []>} : vector<8x32xf32>, vector<32x128xf32>, vector<8x128xf32> -> vector<8x128xf32>
    %7 = vector.extract_strided_slice %0 {offsets = [0, 0], sizes = [1, 128], strides = [1, 1]} : vector<2x128xf32> to vector<1x128xf32>
    %8 = vector.broadcast %7 : vector<1x128xf32> to vector<8x128xf32>
    %9 = arith.addf %6, %8 : vector<8x128xf32>
    %cst_11 = arith.constant 0.000000e+00 : f32
    %10 = vector.broadcast %cst_11 : f32 to vector<8x128xf32>
    %11 = arith.cmpf oge, %9, %10 : vector<8x128xf32>
    %cst_12 = arith.constant 2.000000e-02 : f32
    %12 = vector.broadcast %cst_12 : f32 to vector<8x128xf32>
    %13 = arith.mulf %12, %9 : vector<8x128xf32>
    %14 = arith.select %11, %9, %13 : vector<8x128xi1>, vector<8x128xf32>
    %c0_13 = arith.constant 0 : index
    %c0_14 = arith.constant 0 : index
    %15 = vector.load %arg5[%c0_13, %c0_14] : memref<128x128xf32, #tpu.memory_space<vmem>>, vector<128x128xf32>
    %cst_15 = arith.constant dense<0.000000e+00> : vector<8x128xf32>
    %16 = tpu.matmul %14, %15, %cst_15 {dimension_numbers = #tpu.dot_dimension_numbers<[1], [0], [0], [1], [0, 0, 1, 1], [], []>} : vector<8x128xf32>, vector<128x128xf32>, vector<8x128xf32> -> vector<8x128xf32>
    %17 = vector.extract_strided_slice %0 {offsets = [1, 0], sizes = [1, 128], strides = [1, 1]} : vector<2x128xf32> to vector<1x128xf32>
    %18 = vector.broadcast %17 : vector<1x128xf32> to vector<8x128xf32>
    %19 = arith.addf %16, %18 : vector<8x128xf32>
    %cst_16 = arith.constant 0.000000e+00 : f32
    %20 = vector.broadcast %cst_16 : f32 to vector<8x128xf32>
    %21 = arith.cmpf oge, %19, %20 : vector<8x128xf32>
    %cst_17 = arith.constant 2.000000e-02 : f32
    %22 = vector.broadcast %cst_17 : f32 to vector<8x128xf32>
    %23 = arith.mulf %22, %19 : vector<8x128xf32>
    %24 = arith.select %21, %19, %23 : vector<8x128xi1>, vector<8x128xf32>
    %c0_18 = arith.constant 0 : index
    %c0_19 = arith.constant 0 : index
    %25 = vector.load %arg7[%c0_18, %c0_19] : memref<128x96xf32, #tpu.memory_space<vmem>>, vector<128x96xf32>
    %cst_20 = arith.constant dense<0.000000e+00> : vector<8x96xf32>
    %26 = tpu.matmul %24, %25, %cst_20 {dimension_numbers = #tpu.dot_dimension_numbers<[1], [0], [0], [1], [0, 0, 1, 1], [], []>} : vector<8x128xf32>, vector<128x96xf32>, vector<8x96xf32> -> vector<8x96xf32>
    %27 = vector.extract_strided_slice %1 {offsets = [3, 0], sizes = [1, 96], strides = [1, 1]} : vector<8x96xf32> to vector<1x96xf32>
    %28 = vector.broadcast %27 : vector<1x96xf32> to vector<8x96xf32>
    %29 = arith.addf %26, %28 : vector<8x96xf32>
    %c0_21 = arith.constant 0 : index
    %c0_22 = arith.constant 0 : index
    %30 = vector.load %arg1[%c0_21, %c0_22] : memref<8x4xf32, #tpu.memory_space<vmem>>, vector<8x4xf32>
    %c0_23 = arith.constant 0 : index
    %c0_24 = arith.constant 0 : index
    %31 = vector.load %arg6[%c0_23, %c0_24] : memref<4x32xf32, #tpu.memory_space<vmem>>, vector<4x32xf32>
    %cst_25 = arith.constant dense<0.000000e+00> : vector<8x32xf32>
    %32 = tpu.matmul %30, %31, %cst_25 {dimension_numbers = #tpu.dot_dimension_numbers<[1], [0], [0], [1], [0, 0, 1, 1], [], []>} : vector<8x4xf32>, vector<4x32xf32>, vector<8x32xf32> -> vector<8x32xf32>
    %33 = vector.extract_strided_slice %1 {offsets = [7, 0], sizes = [1, 32], strides = [1, 1]} : vector<8x96xf32> to vector<1x32xf32>
    %34 = vector.broadcast %33 : vector<1x32xf32> to vector<8x32xf32>
    %35 = arith.addf %32, %34 : vector<8x32xf32>
    %36 = vector.extract_strided_slice %1 {offsets = [0, 0], sizes = [1, 32], strides = [1, 1]} : vector<8x96xf32> to vector<1x32xf32>
    %37 = vector.extract_strided_slice %1 {offsets = [1, 0], sizes = [1, 32], strides = [1, 1]} : vector<8x96xf32> to vector<1x32xf32>
    %cst_26 = arith.constant dense<0.000000e+00> : vector<8xf32>
    %38 = vector.multi_reduction <add>, %35, %cst_26 [1] : vector<8x32xf32> to vector<8xf32>
    %39 = vector.shape_cast %38 : vector<8xf32> to vector<8x1xf32>
    %cst_27 = arith.constant 3.200000e+01 : f32
    %40 = vector.broadcast %cst_27 : f32 to vector<8x1xf32>
    %41 = arith.divf %39, %40 : vector<8x1xf32>
    %42 = vector.broadcast %41 : vector<8x1xf32> to vector<8x32xf32>
    %43 = arith.subf %35, %42 : vector<8x32xf32>
    %44 = arith.mulf %43, %43 : vector<8x32xf32>
    %cst_28 = arith.constant dense<0.000000e+00> : vector<8xf32>
    %45 = vector.multi_reduction <add>, %44, %cst_28 [1] : vector<8x32xf32> to vector<8xf32>
    %46 = vector.shape_cast %45 : vector<8xf32> to vector<8x1xf32>
    %cst_29 = arith.constant 3.200000e+01 : f32
    %47 = vector.broadcast %cst_29 : f32 to vector<8x1xf32>
    %48 = arith.divf %46, %47 : vector<8x1xf32>
    %cst_30 = arith.constant 9.99999974E-6 : f32
    %49 = vector.broadcast %cst_30 : f32 to vector<8x1xf32>
    %50 = arith.addf %48, %49 : vector<8x1xf32>
    %51 = math.rsqrt %50 : vector<8x1xf32>
    %52 = vector.broadcast %51 : vector<8x1xf32> to vector<8x32xf32>
    %53 = arith.mulf %43, %52 : vector<8x32xf32>
    %54 = vector.broadcast %36 : vector<1x32xf32> to vector<8x32xf32>
    %55 = arith.mulf %53, %54 : vector<8x32xf32>
    %56 = vector.broadcast %37 : vector<1x32xf32> to vector<8x32xf32>
    %57 = arith.addf %55, %56 : vector<8x32xf32>
    %cst_31 = arith.constant 0.000000e+00 : f32
    %58 = vector.broadcast %cst_31 : f32 to vector<8x32xf32>
    %59 = arith.cmpf oge, %57, %58 : vector<8x32xf32>
    %cst_32 = arith.constant 2.000000e-02 : f32
    %60 = vector.broadcast %cst_32 : f32 to vector<8x32xf32>
    %61 = arith.mulf %60, %57 : vector<8x32xf32>
    %62 = arith.select %59, %57, %61 : vector<8x32xi1>, vector<8x32xf32>
    %63 = vector.extract_strided_slice %2 {offsets = [0, 0], sizes = [32, 32], strides = [1, 1]} : vector<32x96xf32> to vector<32x32xf32>
    %cst_33 = arith.constant dense<0.000000e+00> : vector<8x32xf32>
    %64 = tpu.matmul %62, %63, %cst_33 {dimension_numbers = #tpu.dot_dimension_numbers<[1], [0], [0], [1], [0, 0, 1, 1], [], []>} : vector<8x32xf32>, vector<32x32xf32>, vector<8x32xf32> -> vector<8x32xf32>
    %65 = vector.extract_strided_slice %1 {offsets = [2, 0], sizes = [1, 32], strides = [1, 1]} : vector<8x96xf32> to vector<1x32xf32>
    %66 = vector.broadcast %65 : vector<1x32xf32> to vector<8x32xf32>
    %67 = arith.addf %64, %66 : vector<8x32xf32>
    %68 = vector.extract_strided_slice %29 {offsets = [0, 0], sizes = [8, 32], strides = [1, 1]} : vector<8x96xf32> to vector<8x32xf32>
    %69 = arith.addf %67, %68 : vector<8x32xf32>
    %70 = vector.extract_strided_slice %1 {offsets = [4, 0], sizes = [1, 32], strides = [1, 1]} : vector<8x96xf32> to vector<1x32xf32>
    %71 = vector.extract_strided_slice %1 {offsets = [5, 0], sizes = [1, 32], strides = [1, 1]} : vector<8x96xf32> to vector<1x32xf32>
    %cst_34 = arith.constant dense<0.000000e+00> : vector<8xf32>
    %72 = vector.multi_reduction <add>, %69, %cst_34 [1] : vector<8x32xf32> to vector<8xf32>
    %73 = vector.shape_cast %72 : vector<8xf32> to vector<8x1xf32>
    %cst_35 = arith.constant 3.200000e+01 : f32
    %74 = vector.broadcast %cst_35 : f32 to vector<8x1xf32>
    %75 = arith.divf %73, %74 : vector<8x1xf32>
    %76 = vector.broadcast %75 : vector<8x1xf32> to vector<8x32xf32>
    %77 = arith.subf %69, %76 : vector<8x32xf32>
    %78 = arith.mulf %77, %77 : vector<8x32xf32>
    %cst_36 = arith.constant dense<0.000000e+00> : vector<8xf32>
    %79 = vector.multi_reduction <add>, %78, %cst_36 [1] : vector<8x32xf32> to vector<8xf32>
    %80 = vector.shape_cast %79 : vector<8xf32> to vector<8x1xf32>
    %cst_37 = arith.constant 3.200000e+01 : f32
    %81 = vector.broadcast %cst_37 : f32 to vector<8x1xf32>
    %82 = arith.divf %80, %81 : vector<8x1xf32>
    %cst_38 = arith.constant 9.99999974E-6 : f32
    %83 = vector.broadcast %cst_38 : f32 to vector<8x1xf32>
    %84 = arith.addf %82, %83 : vector<8x1xf32>
    %85 = math.rsqrt %84 : vector<8x1xf32>
    %86 = vector.broadcast %85 : vector<8x1xf32> to vector<8x32xf32>
    %87 = arith.mulf %77, %86 : vector<8x32xf32>
    %88 = vector.broadcast %70 : vector<1x32xf32> to vector<8x32xf32>
    %89 = arith.mulf %87, %88 : vector<8x32xf32>
    %90 = vector.broadcast %71 : vector<1x32xf32> to vector<8x32xf32>
    %91 = arith.addf %89, %90 : vector<8x32xf32>
    %cst_39 = arith.constant 0.000000e+00 : f32
    %92 = vector.broadcast %cst_39 : f32 to vector<8x32xf32>
    %93 = arith.cmpf oge, %91, %92 : vector<8x32xf32>
    %cst_40 = arith.constant 2.000000e-02 : f32
    %94 = vector.broadcast %cst_40 : f32 to vector<8x32xf32>
    %95 = arith.mulf %94, %91 : vector<8x32xf32>
    %96 = arith.select %93, %91, %95 : vector<8x32xi1>, vector<8x32xf32>
    %97 = vector.extract_strided_slice %3 {offsets = [0, 0], sizes = [32, 32], strides = [1, 1]} : vector<32x96xf32> to vector<32x32xf32>
    %cst_41 = arith.constant dense<0.000000e+00> : vector<8x32xf32>
    %98 = tpu.matmul %96, %97, %cst_41 {dimension_numbers = #tpu.dot_dimension_numbers<[1], [0], [0], [1], [0, 0, 1, 1], [], []>} : vector<8x32xf32>, vector<32x32xf32>, vector<8x32xf32> -> vector<8x32xf32>
    %99 = vector.extract_strided_slice %1 {offsets = [6, 0], sizes = [1, 32], strides = [1, 1]} : vector<8x96xf32> to vector<1x32xf32>
    %100 = vector.broadcast %99 : vector<1x32xf32> to vector<8x32xf32>
    %101 = arith.addf %98, %100 : vector<8x32xf32>
    %102 = vector.extract_strided_slice %1 {offsets = [0, 32], sizes = [1, 32], strides = [1, 1]} : vector<8x96xf32> to vector<1x32xf32>
    %103 = vector.extract_strided_slice %1 {offsets = [1, 32], sizes = [1, 32], strides = [1, 1]} : vector<8x96xf32> to vector<1x32xf32>
    %cst_42 = arith.constant dense<0.000000e+00> : vector<8xf32>
    %104 = vector.multi_reduction <add>, %101, %cst_42 [1] : vector<8x32xf32> to vector<8xf32>
    %105 = vector.shape_cast %104 : vector<8xf32> to vector<8x1xf32>
    %cst_43 = arith.constant 3.200000e+01 : f32
    %106 = vector.broadcast %cst_43 : f32 to vector<8x1xf32>
    %107 = arith.divf %105, %106 : vector<8x1xf32>
    %108 = vector.broadcast %107 : vector<8x1xf32> to vector<8x32xf32>
    %109 = arith.subf %101, %108 : vector<8x32xf32>
    %110 = arith.mulf %109, %109 : vector<8x32xf32>
    %cst_44 = arith.constant dense<0.000000e+00> : vector<8xf32>
    %111 = vector.multi_reduction <add>, %110, %cst_44 [1] : vector<8x32xf32> to vector<8xf32>
    %112 = vector.shape_cast %111 : vector<8xf32> to vector<8x1xf32>
    %cst_45 = arith.constant 3.200000e+01 : f32
    %113 = vector.broadcast %cst_45 : f32 to vector<8x1xf32>
    %114 = arith.divf %112, %113 : vector<8x1xf32>
    %cst_46 = arith.constant 9.99999974E-6 : f32
    %115 = vector.broadcast %cst_46 : f32 to vector<8x1xf32>
    %116 = arith.addf %114, %115 : vector<8x1xf32>
    %117 = math.rsqrt %116 : vector<8x1xf32>
    %118 = vector.broadcast %117 : vector<8x1xf32> to vector<8x32xf32>
    %119 = arith.mulf %109, %118 : vector<8x32xf32>
    %120 = vector.broadcast %102 : vector<1x32xf32> to vector<8x32xf32>
    %121 = arith.mulf %119, %120 : vector<8x32xf32>
    %122 = vector.broadcast %103 : vector<1x32xf32> to vector<8x32xf32>
    %123 = arith.addf %121, %122 : vector<8x32xf32>
    %cst_47 = arith.constant 0.000000e+00 : f32
    %124 = vector.broadcast %cst_47 : f32 to vector<8x32xf32>
    %125 = arith.cmpf oge, %123, %124 : vector<8x32xf32>
    %cst_48 = arith.constant 2.000000e-02 : f32
    %126 = vector.broadcast %cst_48 : f32 to vector<8x32xf32>
    %127 = arith.mulf %126, %123 : vector<8x32xf32>
    %128 = arith.select %125, %123, %127 : vector<8x32xi1>, vector<8x32xf32>
    %129 = vector.extract_strided_slice %2 {offsets = [0, 32], sizes = [32, 32], strides = [1, 1]} : vector<32x96xf32> to vector<32x32xf32>
    %cst_49 = arith.constant dense<0.000000e+00> : vector<8x32xf32>
    %130 = tpu.matmul %128, %129, %cst_49 {dimension_numbers = #tpu.dot_dimension_numbers<[1], [0], [0], [1], [0, 0, 1, 1], [], []>} : vector<8x32xf32>, vector<32x32xf32>, vector<8x32xf32> -> vector<8x32xf32>
    %131 = vector.extract_strided_slice %1 {offsets = [2, 32], sizes = [1, 32], strides = [1, 1]} : vector<8x96xf32> to vector<1x32xf32>
    %132 = vector.broadcast %131 : vector<1x32xf32> to vector<8x32xf32>
    %133 = arith.addf %130, %132 : vector<8x32xf32>
    %134 = vector.extract_strided_slice %29 {offsets = [0, 32], sizes = [8, 32], strides = [1, 1]} : vector<8x96xf32> to vector<8x32xf32>
    %135 = arith.addf %133, %134 : vector<8x32xf32>
    %136 = vector.extract_strided_slice %1 {offsets = [4, 32], sizes = [1, 32], strides = [1, 1]} : vector<8x96xf32> to vector<1x32xf32>
    %137 = vector.extract_strided_slice %1 {offsets = [5, 32], sizes = [1, 32], strides = [1, 1]} : vector<8x96xf32> to vector<1x32xf32>
    %cst_50 = arith.constant dense<0.000000e+00> : vector<8xf32>
    %138 = vector.multi_reduction <add>, %135, %cst_50 [1] : vector<8x32xf32> to vector<8xf32>
    %139 = vector.shape_cast %138 : vector<8xf32> to vector<8x1xf32>
    %cst_51 = arith.constant 3.200000e+01 : f32
    %140 = vector.broadcast %cst_51 : f32 to vector<8x1xf32>
    %141 = arith.divf %139, %140 : vector<8x1xf32>
    %142 = vector.broadcast %141 : vector<8x1xf32> to vector<8x32xf32>
    %143 = arith.subf %135, %142 : vector<8x32xf32>
    %144 = arith.mulf %143, %143 : vector<8x32xf32>
    %cst_52 = arith.constant dense<0.000000e+00> : vector<8xf32>
    %145 = vector.multi_reduction <add>, %144, %cst_52 [1] : vector<8x32xf32> to vector<8xf32>
    %146 = vector.shape_cast %145 : vector<8xf32> to vector<8x1xf32>
    %cst_53 = arith.constant 3.200000e+01 : f32
    %147 = vector.broadcast %cst_53 : f32 to vector<8x1xf32>
    %148 = arith.divf %146, %147 : vector<8x1xf32>
    %cst_54 = arith.constant 9.99999974E-6 : f32
    %149 = vector.broadcast %cst_54 : f32 to vector<8x1xf32>
    %150 = arith.addf %148, %149 : vector<8x1xf32>
    %151 = math.rsqrt %150 : vector<8x1xf32>
    %152 = vector.broadcast %151 : vector<8x1xf32> to vector<8x32xf32>
    %153 = arith.mulf %143, %152 : vector<8x32xf32>
    %154 = vector.broadcast %136 : vector<1x32xf32> to vector<8x32xf32>
    %155 = arith.mulf %153, %154 : vector<8x32xf32>
    %156 = vector.broadcast %137 : vector<1x32xf32> to vector<8x32xf32>
    %157 = arith.addf %155, %156 : vector<8x32xf32>
    %cst_55 = arith.constant 0.000000e+00 : f32
    %158 = vector.broadcast %cst_55 : f32 to vector<8x32xf32>
    %159 = arith.cmpf oge, %157, %158 : vector<8x32xf32>
    %cst_56 = arith.constant 2.000000e-02 : f32
    %160 = vector.broadcast %cst_56 : f32 to vector<8x32xf32>
    %161 = arith.mulf %160, %157 : vector<8x32xf32>
    %162 = arith.select %159, %157, %161 : vector<8x32xi1>, vector<8x32xf32>
    %163 = vector.extract_strided_slice %3 {offsets = [0, 32], sizes = [32, 32], strides = [1, 1]} : vector<32x96xf32> to vector<32x32xf32>
    %cst_57 = arith.constant dense<0.000000e+00> : vector<8x32xf32>
    %164 = tpu.matmul %162, %163, %cst_57 {dimension_numbers = #tpu.dot_dimension_numbers<[1], [0], [0], [1], [0, 0, 1, 1], [], []>} : vector<8x32xf32>, vector<32x32xf32>, vector<8x32xf32> -> vector<8x32xf32>
    %165 = vector.extract_strided_slice %1 {offsets = [6, 32], sizes = [1, 32], strides = [1, 1]} : vector<8x96xf32> to vector<1x32xf32>
    %166 = vector.broadcast %165 : vector<1x32xf32> to vector<8x32xf32>
    %167 = arith.addf %164, %166 : vector<8x32xf32>
    %168 = vector.extract_strided_slice %1 {offsets = [0, 64], sizes = [1, 32], strides = [1, 1]} : vector<8x96xf32> to vector<1x32xf32>
    %169 = vector.extract_strided_slice %1 {offsets = [1, 64], sizes = [1, 32], strides = [1, 1]} : vector<8x96xf32> to vector<1x32xf32>
    %cst_58 = arith.constant dense<0.000000e+00> : vector<8xf32>
    %170 = vector.multi_reduction <add>, %167, %cst_58 [1] : vector<8x32xf32> to vector<8xf32>
    %171 = vector.shape_cast %170 : vector<8xf32> to vector<8x1xf32>
    %cst_59 = arith.constant 3.200000e+01 : f32
    %172 = vector.broadcast %cst_59 : f32 to vector<8x1xf32>
    %173 = arith.divf %171, %172 : vector<8x1xf32>
    %174 = vector.broadcast %173 : vector<8x1xf32> to vector<8x32xf32>
    %175 = arith.subf %167, %174 : vector<8x32xf32>
    %176 = arith.mulf %175, %175 : vector<8x32xf32>
    %cst_60 = arith.constant dense<0.000000e+00> : vector<8xf32>
    %177 = vector.multi_reduction <add>, %176, %cst_60 [1] : vector<8x32xf32> to vector<8xf32>
    %178 = vector.shape_cast %177 : vector<8xf32> to vector<8x1xf32>
    %cst_61 = arith.constant 3.200000e+01 : f32
    %179 = vector.broadcast %cst_61 : f32 to vector<8x1xf32>
    %180 = arith.divf %178, %179 : vector<8x1xf32>
    %cst_62 = arith.constant 9.99999974E-6 : f32
    %181 = vector.broadcast %cst_62 : f32 to vector<8x1xf32>
    %182 = arith.addf %180, %181 : vector<8x1xf32>
    %183 = math.rsqrt %182 : vector<8x1xf32>
    %184 = vector.broadcast %183 : vector<8x1xf32> to vector<8x32xf32>
    %185 = arith.mulf %175, %184 : vector<8x32xf32>
    %186 = vector.broadcast %168 : vector<1x32xf32> to vector<8x32xf32>
    %187 = arith.mulf %185, %186 : vector<8x32xf32>
    %188 = vector.broadcast %169 : vector<1x32xf32> to vector<8x32xf32>
    %189 = arith.addf %187, %188 : vector<8x32xf32>
    %cst_63 = arith.constant 0.000000e+00 : f32
    %190 = vector.broadcast %cst_63 : f32 to vector<8x32xf32>
    %191 = arith.cmpf oge, %189, %190 : vector<8x32xf32>
    %cst_64 = arith.constant 2.000000e-02 : f32
    %192 = vector.broadcast %cst_64 : f32 to vector<8x32xf32>
    %193 = arith.mulf %192, %189 : vector<8x32xf32>
    %194 = arith.select %191, %189, %193 : vector<8x32xi1>, vector<8x32xf32>
    %195 = vector.extract_strided_slice %2 {offsets = [0, 64], sizes = [32, 32], strides = [1, 1]} : vector<32x96xf32> to vector<32x32xf32>
    %cst_65 = arith.constant dense<0.000000e+00> : vector<8x32xf32>
    %196 = tpu.matmul %194, %195, %cst_65 {dimension_numbers = #tpu.dot_dimension_numbers<[1], [0], [0], [1], [0, 0, 1, 1], [], []>} : vector<8x32xf32>, vector<32x32xf32>, vector<8x32xf32> -> vector<8x32xf32>
    %197 = vector.extract_strided_slice %1 {offsets = [2, 64], sizes = [1, 32], strides = [1, 1]} : vector<8x96xf32> to vector<1x32xf32>
    %198 = vector.broadcast %197 : vector<1x32xf32> to vector<8x32xf32>
    %199 = arith.addf %196, %198 : vector<8x32xf32>
    %200 = vector.extract_strided_slice %29 {offsets = [0, 64], sizes = [8, 32], strides = [1, 1]} : vector<8x96xf32> to vector<8x32xf32>
    %201 = arith.addf %199, %200 : vector<8x32xf32>
    %202 = vector.extract_strided_slice %1 {offsets = [4, 64], sizes = [1, 32], strides = [1, 1]} : vector<8x96xf32> to vector<1x32xf32>
    %203 = vector.extract_strided_slice %1 {offsets = [5, 64], sizes = [1, 32], strides = [1, 1]} : vector<8x96xf32> to vector<1x32xf32>
    %cst_66 = arith.constant dense<0.000000e+00> : vector<8xf32>
    %204 = vector.multi_reduction <add>, %201, %cst_66 [1] : vector<8x32xf32> to vector<8xf32>
    %205 = vector.shape_cast %204 : vector<8xf32> to vector<8x1xf32>
    %cst_67 = arith.constant 3.200000e+01 : f32
    %206 = vector.broadcast %cst_67 : f32 to vector<8x1xf32>
    %207 = arith.divf %205, %206 : vector<8x1xf32>
    %208 = vector.broadcast %207 : vector<8x1xf32> to vector<8x32xf32>
    %209 = arith.subf %201, %208 : vector<8x32xf32>
    %210 = arith.mulf %209, %209 : vector<8x32xf32>
    %cst_68 = arith.constant dense<0.000000e+00> : vector<8xf32>
    %211 = vector.multi_reduction <add>, %210, %cst_68 [1] : vector<8x32xf32> to vector<8xf32>
    %212 = vector.shape_cast %211 : vector<8xf32> to vector<8x1xf32>
    %cst_69 = arith.constant 3.200000e+01 : f32
    %213 = vector.broadcast %cst_69 : f32 to vector<8x1xf32>
    %214 = arith.divf %212, %213 : vector<8x1xf32>
    %cst_70 = arith.constant 9.99999974E-6 : f32
    %215 = vector.broadcast %cst_70 : f32 to vector<8x1xf32>
    %216 = arith.addf %214, %215 : vector<8x1xf32>
    %217 = math.rsqrt %216 : vector<8x1xf32>
    %218 = vector.broadcast %217 : vector<8x1xf32> to vector<8x32xf32>
    %219 = arith.mulf %209, %218 : vector<8x32xf32>
    %220 = vector.broadcast %202 : vector<1x32xf32> to vector<8x32xf32>
    %221 = arith.mulf %219, %220 : vector<8x32xf32>
    %222 = vector.broadcast %203 : vector<1x32xf32> to vector<8x32xf32>
    %223 = arith.addf %221, %222 : vector<8x32xf32>
    %cst_71 = arith.constant 0.000000e+00 : f32
    %224 = vector.broadcast %cst_71 : f32 to vector<8x32xf32>
    %225 = arith.cmpf oge, %223, %224 : vector<8x32xf32>
    %cst_72 = arith.constant 2.000000e-02 : f32
    %226 = vector.broadcast %cst_72 : f32 to vector<8x32xf32>
    %227 = arith.mulf %226, %223 : vector<8x32xf32>
    %228 = arith.select %225, %223, %227 : vector<8x32xi1>, vector<8x32xf32>
    %229 = vector.extract_strided_slice %3 {offsets = [0, 64], sizes = [32, 32], strides = [1, 1]} : vector<32x96xf32> to vector<32x32xf32>
    %cst_73 = arith.constant dense<0.000000e+00> : vector<8x32xf32>
    %230 = tpu.matmul %228, %229, %cst_73 {dimension_numbers = #tpu.dot_dimension_numbers<[1], [0], [0], [1], [0, 0, 1, 1], [], []>} : vector<8x32xf32>, vector<32x32xf32>, vector<8x32xf32> -> vector<8x32xf32>
    %231 = vector.extract_strided_slice %1 {offsets = [6, 64], sizes = [1, 32], strides = [1, 1]} : vector<8x96xf32> to vector<1x32xf32>
    %232 = vector.broadcast %231 : vector<1x32xf32> to vector<8x32xf32>
    %233 = arith.addf %230, %232 : vector<8x32xf32>
    %cst_74 = arith.constant 0.000000e+00 : f32
    %234 = vector.broadcast %cst_74 : f32 to vector<8x32xf32>
    %235 = arith.cmpf oge, %233, %234 : vector<8x32xf32>
    %cst_75 = arith.constant 2.000000e-02 : f32
    %236 = vector.broadcast %cst_75 : f32 to vector<8x32xf32>
    %237 = arith.mulf %236, %233 : vector<8x32xf32>
    %238 = arith.select %235, %233, %237 : vector<8x32xi1>, vector<8x32xf32>
    %c0_76 = arith.constant 0 : index
    %c0_77 = arith.constant 0 : index
    %239 = vector.load %arg11[%c0_76, %c0_77] : memref<32x4xf32, #tpu.memory_space<vmem>>, vector<32x4xf32>
    %cst_78 = arith.constant dense<0.000000e+00> : vector<8x4xf32>
    %240 = tpu.matmul %238, %239, %cst_78 {dimension_numbers = #tpu.dot_dimension_numbers<[1], [0], [0], [1], [0, 0, 1, 1], [], []>} : vector<8x32xf32>, vector<32x4xf32>, vector<8x4xf32> -> vector<8x4xf32>
    %c0_79 = arith.constant 0 : index
    %c0_80 = arith.constant 0 : index
    %241 = vector.load %arg12[%c0_79, %c0_80] : memref<1x4xf32, #tpu.memory_space<vmem>>, vector<1x4xf32>
    %242 = vector.broadcast %241 : vector<1x4xf32> to vector<8x4xf32>
    %243 = arith.addf %240, %242 : vector<8x4xf32>
    %c0_81 = arith.constant 0 : index
    %c0_82 = arith.constant 0 : index
    %244 = vector.load %arg13[%c0_81, %c0_82] : memref<8x4xf32, #tpu.memory_space<vmem>>, vector<8x4xf32>
    tpu.vector_store %arg13[%c0_81, %c0_82], %243 {strides = array<i32>} : memref<8x4xf32, #tpu.memory_space<vmem>>, vector<8x4xf32>,
    return
  }
  func.func @transform_0(%arg0: i32) -> (i32, i32) {
    %c0_i32 = arith.constant 0 : i32
    %c0_i32_0 = arith.constant 0 : i32
    return %arg0, %c0_i32 : i32, i32
  }
  func.func @transform_1(%arg0: i32) -> (i32, i32) {
    %c0_i32 = arith.constant 0 : i32
    %c0_i32_0 = arith.constant 0 : i32
    return %arg0, %c0_i32 : i32, i32
  }
  func.func @transform_2(%arg0: i32) -> (i32, i32) {
    %c0_i32 = arith.constant 0 : i32
    %c0_i32_0 = arith.constant 0 : i32
    %c0_i32_1 = arith.constant 0 : i32
    return %c0_i32, %c0_i32_0 : i32, i32
  }
  func.func @transform_3(%arg0: i32) -> (i32, i32) {
    %c0_i32 = arith.constant 0 : i32
    %c0_i32_0 = arith.constant 0 : i32
    %c0_i32_1 = arith.constant 0 : i32
    return %c0_i32, %c0_i32_0 : i32, i32
  }
  func.func @transform_4(%arg0: i32) -> (i32, i32) {
    %c0_i32 = arith.constant 0 : i32
    %c0_i32_0 = arith.constant 0 : i32
    %c0_i32_1 = arith.constant 0 : i32
    return %c0_i32, %c0_i32_0 : i32, i32
  }
  func.func @transform_5(%arg0: i32) -> (i32, i32) {
    %c0_i32 = arith.constant 0 : i32
    %c0_i32_0 = arith.constant 0 : i32
    %c0_i32_1 = arith.constant 0 : i32
    return %c0_i32, %c0_i32_0 : i32, i32
  }
  func.func @transform_6(%arg0: i32) -> (i32, i32) {
    %c0_i32 = arith.constant 0 : i32
    %c0_i32_0 = arith.constant 0 : i32
    %c0_i32_1 = arith.constant 0 : i32
    return %c0_i32, %c0_i32_0 : i32, i32
  }
  func.func @transform_7(%arg0: i32) -> (i32, i32) {
    %c0_i32 = arith.constant 0 : i32
    %c0_i32_0 = arith.constant 0 : i32
    %c0_i32_1 = arith.constant 0 : i32
    return %c0_i32, %c0_i32_0 : i32, i32
  }
  func.func @transform_8(%arg0: i32) -> (i32, i32) {
    %c0_i32 = arith.constant 0 : i32
    %c0_i32_0 = arith.constant 0 : i32
    %c0_i32_1 = arith.constant 0 : i32
    return %c0_i32, %c0_i32_0 : i32, i32
  }
  func.func @transform_9(%arg0: i32) -> (i32, i32) {
    %c0_i32 = arith.constant 0 : i32
    %c0_i32_0 = arith.constant 0 : i32
    %c0_i32_1 = arith.constant 0 : i32
    return %c0_i32, %c0_i32_0 : i32, i32
  }
  func.func @transform_10(%arg0: i32) -> (i32, i32) {
    %c0_i32 = arith.constant 0 : i32
    %c0_i32_0 = arith.constant 0 : i32
    %c0_i32_1 = arith.constant 0 : i32
    return %c0_i32, %c0_i32_0 : i32, i32
  }
  func.func @transform_11(%arg0: i32) -> (i32, i32) {
    %c0_i32 = arith.constant 0 : i32
    %c0_i32_0 = arith.constant 0 : i32
    %c0_i32_1 = arith.constant 0 : i32
    return %c0_i32, %c0_i32_0 : i32, i32
  }
  func.func @transform_12(%arg0: i32) -> (i32, i32) {
    %c0_i32 = arith.constant 0 : i32
    %c0_i32_0 = arith.constant 0 : i32
    return %arg0, %c0_i32 : i32, i32
  }
}

</mosaic_0001>

<bundles_post_ra>
// kernel: _forward_jit.1
= control target key start
LH: loop header
LB: loop body
LE: loop exit
PB: predicated region body
PF: predicated region fallthrough
CT: control target
= control target key end

     0   :  { %17 = vsyncpa [#allocation3], 0  ;;  %s2406_s0 = inlined_call_operand.vmem [shape: f32[8,4], index: 0, kind: input, shape index: {}]   ;;  %s2407_s1 = inlined_call_operand.vmem [shape: f32[8,1], index: 1, kind: input, shape index: {}]   ;;  %s2408_s2 = inlined_call_operand.vmem [shape: f32[32,128], index: 2, kind: input, shape index: {}]   ;;  %s2409_s3 = inlined_call_operand.vmem [shape: f32[2,128], index: 3, kind: input, shape index: {}]   ;;  %s2410_s4 = inlined_call_operand.vmem [shape: f32[128,128], index: 4, kind: input, shape index: {}]   ;;  %s2411_s5 = inlined_call_operand.vmem [shape: f32[4,32], index: 5, kind: input, shape index: {}]   ;;  %s2412_s6 = inlined_call_operand.vmem [shape: f32[128,96], index: 6, kind: input, shape index: {}]   ;;  %s2413_s7 = inlined_call_operand.vmem [shape: f32[32,96], index: 7, kind: input, shape index: {}]   ;;  %s2414_s8 = inlined_call_operand.vmem [shape: f32[32,96], index: 8, kind: input, shape index: {}]   ;;  %s2415_s9 = inlined_call_operand.hbm [shape: f32[8,96], index: 9, kind: input, shape index: {}]   ;;  %s2416_s10 = inlined_call_operand.vmem [shape: f32[32,4], index: 10, kind: input, shape index: {}]   ;;  %s2417_s11 = inlined_call_operand.hbm [shape: f32[1,4], index: 11, kind: input, shape index: {}]   ;;  %s2418_s12 = inlined_call_operand.vmem [shape: f32[8,4], index: 12, kind: output, shape index: {}]  }
   0x1   :  { %18 = vsyncpa [#allocation5], 0  ;;  %s1906_s21 = smov [#allocation2]   ;;  %s1907_s23 = smov [#allocation4]  }
   0x2   :  { %s43_s22 = sshll.u32 %s1906_s21, 4  ;;  %s55_s24 = sshll.u32 %s1907_s23, 4  ;;  %s44_s22 = int_to_ptr.vmem [resolvable:$true] %s43_s22  ;;  %s56_s24 = int_to_ptr.vmem [resolvable:$true] %s55_s24 }
   0x3   :  { %s1858_s27 = scalar_lea.hbm %s2415_s9, 128 }
   0x4   :  { %p1859_p0 = scmp.ne.s32.totalorder %s2415_s9, %s1858_s27  ;;  %p1862_p1 = scmp.lt.u32.totalorder %s1858_s27, %s2415_s9 }
   0x6   :  { %p1864_p2 = pnand %p1862_p1, %p1859_p0 }
   0x8   :  { %1867 = shalt.err (!%p1864_p2)
}
   0x9   :  { %s1868_s14 = scalar_lea.vmem %s44_s22, 128  ;;  %p1873_p4 = scmp.lt.s32.totalorder %s44_s22, %s44_s22 }
   0xa   :  { %p1869_p3 = scmp.ne.s32.totalorder %s44_s22, %s1868_s14  ;;  %p1874_p5 = scmp.lt.s32.totalorder %s1868_s14, %s1868_s14 }
   0xc   :  { %p1875_p6 = por %p1874_p5, %p1873_p4 }
   0xe   :  { %p1876_p7 = pnand %p1875_p6, %p1869_p3 }
  0x10   :  { %1879 = shalt.err (!%p1876_p7)
}
  0x11   :  { %46 = dma.hbm_to_vmem [thread:$0]  %s2415_s9, 128, %s44_s22, [#allocation3]  }
  0x12   :  { %s1880_s19 = scalar_lea.hbm %s2417_s11, 16 }
  0x13   :  { %p1881_p8 = scmp.ne.s32.totalorder %s2417_s11, %s1880_s19  ;;  %p1884_p9 = scmp.lt.u32.totalorder %s1880_s19, %s2417_s11 }
  0x15   :  { %p1886_p10 = pnand %p1884_p9, %p1881_p8 }
  0x17   :  { %1889 = shalt.err (!%p1886_p10)
}
  0x18   :  { %s1890_s26 = scalar_lea.vmem %s56_s24, 16  ;;  %s1894_s27 = scalar_lea.vmem %s56_s24, 32 }
  0x19   :  { %p1891_p11 = scmp.ne.s32.totalorder %s56_s24, %s1890_s26  ;;  %p1895_p12 = scmp.lt.s32.totalorder %s56_s24, %s56_s24 }
  0x1a   :  { %p1896_p13 = scmp.lt.s32.totalorder %s1894_s27, %s1890_s26 }
  0x1c   :  { %p1897_p0 = por %p1896_p13, %p1895_p12 }
  0x1e   :  { %p1898_p1 = pnand %p1897_p0, %p1891_p11 }
  0x20   :  { %1901 = shalt.err (!%p1898_p1)
}
  0x21   :  { %58 = dma.hbm_to_vmem [thread:$0]  %s2417_s11, 16, %s56_s24, [#allocation5]  }
  0x22   :  { %1902 = dma.done.wait [#allocation3], 128  }
  0x23   :  { %1903 = vsyncadd [#allocation3], 4294967168 }
  0x24   :  { %1904 = dma.done.wait [#allocation5], 16  }
  0x25   :  { %1905 = vsyncadd [#allocation5], 4294967280  ;;  %v1908_v0 = vmov 0   ;;  %v86_v1 = vld [vmem:[%s2407_s1] sm:$0xff]  ;;  %v302_v3 = vld [vmem:[%s2408_s2 + $0x8] sm:$0xff]  ;;  %v1909_v5 = vmov 0.0|0.0   ;;  %v75_v10 = vlaneseq }
  0x26   :  { %1799 = vset.pattern.permute.xlu0 %v1908_v0  ;;  %v301_v2 = vld [vmem:[%s2408_s2] sm:$0xff]  ;;  %v303_v4 = vld [vmem:[%s2408_s2 + $0x10] sm:$0xff]  ;;  %1685 = vmatprep.subr.bf16.mxu0 %v1909_v5  ;;  %v304_v7 = vld [vmem:[%s2408_s2 + $0x18] sm:$0xff]  ;;  %vm1910_vm0 = vmmov 0   ;;  %v1911_v8 = vmov 0.0   ;;  %s1919_s29 = smov 64  }
  0x27   :  { %89 = vperm.xlu0 %1799, %v86_v1   ;;  %v1686_v6 = vpack.c.bf16 %v302_v3, %v301_v2  ;;  %1530 = vmatprep.mubr.msk.f32.mxu0 %vm1910_vm0, %v1911_v8  ;;  %v1689_v9 = vpack.c.bf16 %v304_v7, %v303_v4  ;;  %v386_v11 = vld [vmem:[%s2410_s4] sm:$0xff]  ;;  %v387_v12 = vld [vmem:[%s2410_s4 + $0x8] sm:$0xff]  ;;  %v388_v13 = vld [vmem:[%s2410_s4 + $0x10] sm:$0xff]  ;;  %v2045_v16 = vand.u32 127, %v75_v10  ;;  %v1912_v52 = vmov 683565275  }
  0x28   :  { %1691 = vmatprep.subr.bf16.mxu1 %v1909_v5  ;;  %1565 = vmatprep.mubr.msk.f32.mxu1 %vm1910_vm0, %v1911_v8  ;;  %v1692_v14 = vpack.c.bf16 %v387_v12, %v386_v11  ;;  %v389_v15 = vld [vmem:[%s2410_s4 + $0x18] sm:$0xff]  ;;  %v390_v18 = vld [vmem:[%s2410_s4 + $0x20] sm:$0xff]  ;;  %v391_v19 = vld [vmem:[%s2410_s4 + $0x28] sm:$0xff]  ;;  %v1913_v54 = vmov 2475754826  }
  0x29   :  { %1687 = vmatpush3.bf16.msra.mxu0 %v1686_v6  ;;  %v1695_v17 = vpack.c.bf16 %v389_v15, %v388_v13  ;;  %v1426_v20 = vadd.s32 4294967280, %v2045_v16  ;;  %v1698_v21 = vpack.c.bf16 %v391_v19, %v390_v18  ;;  %vm77_vm1 = vcmp.lt.s32.totalorder %v2045_v16, 16  ;;  %v392_v22 = vld [vmem:[%s2410_s4 + $0x30] sm:$0xff]  ;;  %v393_v23 = vld [vmem:[%s2410_s4 + $0x38] sm:$0xff]  ;;  %v394_v26 = vld [vmem:[%s2410_s4 + $0x40] sm:$0xff] }
  0x2a   :  { %1688 = vmatprep.subr.bf16.mxu0 %v1909_v5  ;;  %1693 = vmatpush3.bf16.msra.mxu1 %v1692_v14  ;;  %v1701_v25 = vpack.c.bf16 %v393_v23, %v392_v22  ;;  %v395_v27 = vld [vmem:[%s2410_s4 + $0x48] sm:$0xff]  ;;  %v396_v30 = vld [vmem:[%s2410_s4 + $0x50] sm:$0xff]  ;;  %v397_v31 = vld [vmem:[%s2410_s4 + $0x58] sm:$0xff]  ;;  %v1914_v57 = vmov 2131351028  }
  0x2b   :  { %1694 = vmatprep.subr.bf16.mxu1 %v1909_v5  ;;  %v79_v24 = vsel %vm77_vm1, %v2045_v16, %v1426_v20  ;;  %v1704_v29 = vpack.c.bf16 %v395_v27, %v394_v26  ;;  %v1707_v33 = vpack.c.bf16 %v397_v31, %v396_v30  ;;  %v398_v34 = vld [vmem:[%s2410_s4 + $0x60] sm:$0xff]  ;;  %v399_v35 = vld [vmem:[%s2410_s4 + $0x68] sm:$0xff]  ;;  %v1915_v60 = vmov 2102212464  }
  0x2c   :  { %v80_v28 = vcvt.s32.f32 %v79_v24  ;;  %v1710_v37 = vpack.c.bf16 %v399_v35, %v398_v34  ;;  %v1916_v63 = vmov 920167782   ;;  %v1917_v2 = vmov 1326507024   ;;  %v479_v16 = vld [vmem:[%s2412_s6] sm:$0xff] }
  0x2d   :  { %1690 = vmatpush3.bf16.msra.mxu0 %v1689_v9 }
  0x2e   :  { %1715 = vmatprep.subr.bf16.mxu0 %v1909_v5  ;;  %1696 = vmatpush3.bf16.msra.mxu1 %v1695_v17  ;;  %v81_v32 = vmul.f32 -9.2103405, %v80_v28 }
  0x2f   :  { %1697 = vmatprep.subr.bf16.mxu1 %v1909_v5 }
  0x30   :  { %v83_v36 = vmul.f32 0.06666667, %v81_v32 }
  0x32   :  { %1699 = vmatpush3.bf16.msra.mxu1 %v1698_v21  ;;  %v84_v38 = vmul.f32 1.442695, %v83_v36 }
  0x33   :  { %1700 = vmatprep.subr.bf16.mxu1 %v1909_v5 }
  0x34   :  { %1840 = vpow2.f32 %v84_v38 }
  0x36   :  { %1702 = vmatpush3.bf16.msra.mxu1 %v1701_v25 }
  0x37   :  { %1703 = vmatprep.subr.bf16.mxu1 %v1909_v5 }
  0x3a   :  { %1705 = vmatpush3.bf16.msra.mxu1 %v1704_v29 }
  0x3b   :  { %1706 = vmatprep.subr.bf16.mxu1 %v1909_v5 }
  0x3e   :  { %1708 = vmatpush3.bf16.msra.mxu1 %v1707_v33  ;;  %v1841_v39 = vpop.eup %1840 }
  0x3f   :  { %1709 = vmatprep.subr.bf16.mxu1 %v1909_v5 }
  0x42   :  { %1711 = vmatpush3.bf16.msra.mxu1 %v1710_v37 }
  0x43   :  { %1712 = vmatprep.subr.bf16.mxu1 %v1909_v5 }
  0xa6   :  { %v90_v40 = vpop.permute.xlu0 %89 }
  0xa7   :  { %v2089_v41 = vmul.f32 %v1841_v39, %v90_v40 }
  0xa9   :  { %v96_v42 = vand.u32 2139095040, %v2089_v41  ;;  %v93_v46 = vand.u32 2147483647, %v2089_v41  ;;  %vm95_vm9 = vcmp.lt.s32.totalorder %v2089_v41, 0 }
  0xab   :  { %v97_v43 = vshrl.u32 %v96_v42, 23  ;;  %v100_v49 = vand.u32 8388607, %v93_v46  ;;  %vm94_vm10 = vcmp.le.f32.partialorder %v93_v46, 0.7853982 }
  0xad   :  { %v1427_v44 = vadd.s32 4294967169, %v97_v43  ;;  %v101_v4 = vor.u32 8388608, %v100_v49 }
  0xaf   :  { %v103_v45 = vadd.s32 1, %v1427_v44  ;;  %v141_v22 = vshll.u32 %v101_v4, 8 }
  0xb1   :  { %vm104_vm2 = vcmp.gt.s32.totalorder %v103_v45, 0 }
  0xb2   :  { %v105_v47 = vsel %vm104_vm2, %v103_v45, 0 }
  0xb3   :  { %v107_v48 = vand.u32 31, %v105_v47  ;;  %v106_v51 = vshrl.u32 %v105_v47, 5 }
  0xb5   :  { %v108_v50 = vsub.s32 32, %v107_v48  ;;  %v110_v53 = vshll.u32 %v1912_v52, %v107_v48  ;;  %v113_v55 = vshll.u32 %v1913_v54, %v107_v48  ;;  %v116_v59 = vshll.u32 %v1914_v57, %v107_v48 }
  0xb6   :  { %v119_v62 = vshll.u32 %v1915_v60, %v107_v48  ;;  %v122_v1 = vshll.u32 %v1916_v63, %v107_v48  ;;  %vm125_vm3 = vcmp.lt.s32.totalorder %v106_v51, 1  ;;  %vm128_vm4 = vcmp.lt.s32.totalorder %v106_v51, 4 }
  0xb7   :  { %v111_v56 = vshrl.u32 %v1913_v54, %v108_v50  ;;  %v114_v58 = vshrl.u32 %v1914_v57, %v108_v50  ;;  %v117_v61 = vshrl.u32 %v1915_v60, %v108_v50  ;;  %v120_v0 = vshrl.u32 %v1916_v63, %v108_v50 }
  0xb8   :  { %v123_v3 = vshrl.u32 %v1917_v2, %v108_v50  ;;  %v109_v17 = vshrl.u32 %v1912_v52, %v108_v50  ;;  %vm127_vm5 = vcmp.lt.s32.totalorder %v106_v51, 3  ;;  %vm126_vm6 = vcmp.lt.s32.totalorder %v106_v51, 2 }
  0xb9   :  { %v112_v6 = vor.u32 %v111_v56, %v110_v53  ;;  %v115_v7 = vor.u32 %v114_v58, %v113_v55  ;;  %v118_v9 = vor.u32 %v117_v61, %v116_v59  ;;  %v121_v11 = vor.u32 %v120_v0, %v119_v62 }
  0xba   :  { %v124_v12 = vor.u32 %v123_v3, %v122_v1 }
  0xbb   :  { %v130_v13 = vsel %vm128_vm4, %v118_v9, 2102212464  ;;  %v133_v14 = vsel %vm125_vm3, %v112_v6, %v115_v7  ;;  %v137_v15 = vsel %vm125_vm3, %v115_v7, %v118_v9  ;;  %v134_v18 = vsel %vm128_vm4, %v121_v11, 920167782 }
  0xbc   :  { %v138_v19 = vsel %vm128_vm4, %v124_v12, 1326507024  ;;  %v135_v20 = vsel %vm127_vm5, %v118_v9, %v134_v18  ;;  %v129_v23 = vsel %vm125_vm3, %v109_v17, %v112_v6  ;;  %v131_v24 = vsel %vm127_vm5, %v115_v7, %v130_v13 }
  0xbd   :  { %v139_v21 = vsel %vm127_vm5, %v121_v11, %v138_v19  ;;  %v136_v25 = vsel %vm126_vm6, %v133_v14, %v135_v20  ;;  %v132_v31 = vsel %vm126_vm6, %v129_v23, %v131_v24  ;;  %vm185_vm3 = vweird.f32 %v2089_v41  ;;  %v400_v20 = vld [vmem:[%s2410_s4 + $0x70] sm:$0xff] }
  0xbe   :  { %v140_v26 = vsel %vm126_vm6, %v137_v15, %v139_v21  ;;  %v2098_v29 = vmul.u32.u64.low %v141_v22, %v136_v25  ;;  %v2099_v30 = vmul.u32.u64.high %v141_v22, %v136_v25, %v2098_v29  ;;  %v148_v33 = vmul.u32 %v141_v22, %v132_v31  ;;  %v481_v23 = vld [vmem:[%s2412_s6 + $0x10] sm:$0xff]  ;;  %v482_v25 = vld [vmem:[%s2412_s6 + $0x18] sm:$0xff] }
  0xbf   :  { %v2095_v27 = vmul.u32.u64.low %v141_v22, %v140_v26  ;;  %v2096_v28 = vmul.u32.u64.high %v141_v22, %v140_v26, %v2095_v27  ;;  %vm309_vm4 = vcmask 261120   ;;  %v480_v22 = vld [vmem:[%s2412_s6 + $0x8] sm:$0xff]  ;;  %v1719_v26 = vpack.c.bf16 %v482_v25, %v481_v23  ;;  %v486_v31 = vld [vmem:[%s2412_s6 + $0x38] sm:$0xff] }
  0xc0   :  { %v151_v32 = vadd.s32 1, %v2099_v30  ;;  %v1716_v24 = vpack.c.bf16 %v480_v22, %v479_v16  ;;  %v483_v27 = vld [vmem:[%s2412_s6 + $0x20] sm:$0xff]  ;;  %vm579_vm5 = vcmask 1043456   ;;  %vm575_vm6 = vcmask 31744  }
  0xc1   :  { %vm150_vm7 = vc.u32 %v2096_v28, %v2098_v29  ;;  %v149_v47 = vadd.s32 %v2098_v29, %v2096_v28  ;;  %v484_v28 = vld [vmem:[%s2412_s6 + $0x28] sm:$0xff] }
  0xc2   :  { %v152_v34 = vsel %vm150_vm7, %v151_v32, %v2099_v30  ;;  %v1722_v29 = vpack.c.bf16 %v484_v28, %v483_v27  ;;  %v485_v30 = vld [vmem:[%s2412_s6 + $0x30] sm:$0xff] }
  0xc3   :  { %v153_v35 = vadd.s32 %v152_v34, %v148_v33  ;;  %v1725_v32 = vpack.c.bf16 %v486_v31, %v485_v30  ;;  %v487_v33 = vld [vmem:[%s2412_s6 + $0x40] sm:$0xff]  ;;  %v488_v34 = vld [vmem:[%s2412_s6 + $0x48] sm:$0xff] }
  0xc5   :  { %v154_v36 = vadd.s32 536870912, %v153_v35 }
  0xc7   :  { %v155_v37 = vshrl.u32 %v154_v36, 30  ;;  %v489_v36 = vld [vmem:[%s2412_s6 + $0x50] sm:$0xff] }
  0xc9   :  { %v156_v38 = vshll.u32 %v155_v37, 30  ;;  %v179_v59 = vsub.s32 4, %v155_v37 }
  0xcb   :  { %v157_v39 = vsub.s32 %v153_v35, %v156_v38  ;;  %v180_v62 = vsel %vm95_vm9, %v179_v59, %v155_v37  ;;  %v1728_v35 = vpack.c.bf16 %v488_v34, %v487_v33  ;;  %v490_v37 = vld [vmem:[%s2412_s6 + $0x58] sm:$0xff] }
  0xcc   :  { %v182_v0 = vsel %vm94_vm10, 0, %v180_v62  ;;  %v1731_v38 = vpack.c.bf16 %v490_v37, %v489_v36 }
  0xcd   :  { %v159_v40 = vsub.s32 0, %v157_v39  ;;  %v186_v1 = vadd.s32 3, %v182_v0  ;;  %v290_v3 = vand.u32 3, %v182_v0 }
  0xcf   :  { %v1428_v42 = vmin.u32 %v159_v40, %v157_v39  ;;  %v187_v2 = vand.u32 3, %v186_v1  ;;  %vm295_vm12 = vcmp.eq.s32.totalorder %v290_v3, 2  ;;  %vm292_vm14 = vcmp.eq.s32.totalorder %v290_v3, 0  ;;  %v492_v40 = vld [vmem:[%s2412_s6 + $0x68] sm:$0xff] }
  0xd0   :  { %vm291_vm2 = vcmp.lt.s32.totalorder %v290_v3, 2 }
  0xd1   :  { %v161_v43 = vclz %v1428_v42  ;;  %vm192_vm11 = vcmp.eq.s32.totalorder %v187_v2, 2  ;;  %vm189_vm13 = vcmp.eq.s32.totalorder %v187_v2, 0  ;;  %vm188_vm15 = vcmp.lt.s32.totalorder %v187_v2, 2 }
  0xd3   :  { %v1429_v44 = vadd.s32 4294967294, %v161_v43  ;;  %v2172_v43 = vshrl.u32 %v75_v10, 7 }
  0xd5   :  { %vm1430_vm8 = vcmp.lt.s32.totalorder %v1429_v44, 0  ;;  %v573_v59 = vsub.s32 7, %v2172_v43  ;;  %v682_v33 = vsub.s32 2, %v2172_v43 }
  0xd6   :  { %v164_v45 = vsel %vm1430_vm8, 0, %v1429_v44  ;;  %v307_v44 = vsub.s32 0, %v2172_v43 }
  0xd7   :  { %v165_v48 = vsub.s32 32, %v164_v45  ;;  %v169_v49 = vsub.s32 4294967266, %v164_v45  ;;  %v166_v50 = vshll.u32 %v157_v39, %v164_v45  ;;  %v491_v39 = vld [vmem:[%s2412_s6 + $0x60] sm:$0xff] }
  0xd8   :  { %v1734_v42 = vpack.c.bf16 %v492_v40, %v491_v39  ;;  %v65_v45 = vld [vmem:[%s2409_s3] sm:$0x3] }
  0xd9   :  { %v167_v51 = vshrl.u32 %v149_v47, %v165_v48  ;;  %v170_v52 = vadd.s32 127, %v169_v49  ;;  %v308_v47 = vrot.slane %v65_v45, %v307_v44 }
  0xdb   :  { %v168_v53 = vor.u32 %v167_v51, %v166_v50  ;;  %v171_v54 = vshll.u32 %v170_v52, 23  ;;  %v570_v52 = vld [vmem:[%s2411_s5] sm:$0xf] }
  0xdd   :  { %v172_v55 = vor.u32 4788187, %v171_v54  ;;  %v175_v57 = vcvt.s32.f32 %v168_v53  ;;  %v569_v53 = vld [vmem:[%s2406_s0] sm:$0xff]  ;;  %v493_v54 = vld [vmem:[%s2412_s6 + $0x70] sm:$0xff] }
  0xdf   :  { %v173_v56 = vand.u32 2147483647, %v172_v55  ;;  %v494_v55 = vld [vmem:[%s2412_s6 + $0x78] sm:$0xff] }
  0xe1   :  { %v176_v58 = vmul.f32 %v175_v57, %v173_v56  ;;  %v1737_v56 = vpack.c.bf16 %v494_v55, %v493_v54  ;;  %v404_v57 = vsub.s32 1, %v2172_v43 }
  0xe3   :  { %v177_v60 = vxor.u32 2147483648, %v176_v58 }
  0xe5   :  { %v178_v61 = vsel %vm95_vm9, %v177_v60, %v176_v58  ;;  %v405_v58 = vrot.slane %v65_v45, %v404_v57  ;;  %v2201_v60 = vld [vmem:[#allocation2] sm:$0xff] }
  0xe6   :  { %v181_v63 = vsel %vm94_vm10, %v2089_v41, %v178_v61  ;;  %v401_v41 = vld [vmem:[%s2410_s4 + $0x78] sm:$0xff]  ;;  %v574_v0 = vrot.slane %v2201_v60, %v573_v59  ;;  %v778_v59 = vsub.s32 5, %v2172_v43 }
  0xe7   :  { %1842 = vcosq.f32 %v181_v63  ;;  %v1713_v21 = vpack.c.bf16 %v401_v41, %v400_v20 }
  0xe8   :  { %1844 = vsinq.f32 %v181_v63 }
  0xe9   :  { %1714 = vmatpush3.bf16.msra.mxu1 %v1713_v21 }
  0xea   :  { %1603 = vmatprep.subr.mxu1 %v1911_v8 }
  0xf1   :  { %v1843_v4 = vpop.eup %1842 }
  0xf2   :  { %v1845_v6 = vpop.eup %1844  ;;  %v193_v7 = vxor.u32 2147483648, %v1843_v4 }
  0xf3   :  { %v190_v9 = vxor.u32 2147483648, %v1845_v6 }
  0xf4   :  { %v194_v11 = vsel %vm192_vm11, %v193_v7, %v1845_v6  ;;  %v297_v46 = vsel %vm295_vm12, %v193_v7, %v1845_v6 }
  0xf5   :  { %v191_v12 = vsel %vm189_vm13, %v1843_v4, %v190_v9  ;;  %v294_v13 = vsel %vm292_vm14, %v1843_v4, %v190_v9 }
  0xf6   :  { %v195_v14 = vsel %vm188_vm15, %v191_v12, %v194_v11  ;;  %v298_v15 = vsel %vm291_vm2, %v294_v13, %v297_v46 }
  0xf7   :  { %v196_v17 = vsel %vm185_vm3, nan, %v195_v14  ;;  %v299_v18 = vsel %vm185_vm3, nan, %v298_v15  ;;  %v2211_v14 = vld [vmem:[%s2413_s7] sm:$0xff]  ;;  %v2216_v15 = vld [vmem:[%s2413_s7 + $0x8] sm:$0xff] }
  0xf8   :  { %v300_v19 = vsel %vm77_vm1, %v196_v17, %v299_v18  ;;  %v2221_v17 = vld [vmem:[%s2413_s7 + $0x10] sm:$0xff]  ;;  %v1740_v18 = vpack.c.bf16 %v2216_v15, %v2211_v14 }
  0xf9   :  { %1531 = vmatmul.mubr.msk.f32.vlgmr.msra.gmra.mrb[0].mxu0 %vm309_vm4, %v300_v19  ;;  %v2228_v19 = vld [vmem:[%s2413_s7 + $0x18] sm:$0xff] }
  0xfa   :  { %1600 = vmatprep.mubr.msk.f32.mxu0 %vm1910_vm0, %v1911_v8  ;;  %1717 = vmatpush3.bf16.msra.mxu0 %v1716_v24  ;;  %v1743_v20 = vpack.c.bf16 %v2228_v19, %v2221_v17  ;;  %v2237_v24 = vrot.slane %v2201_v60, %v307_v44 }
  0xfb   :  { %1718 = vmatprep.subr.bf16.mxu0 %v1909_v5 }
  0xfe   :  { %1720 = vmatpush3.bf16.msra.mxu0 %v1719_v26  ;;  %v2240_v26 = vrot.slane %v2201_v60, %v404_v57 }
  0xff   :  { %1721 = vmatprep.subr.bf16.mxu0 %v1909_v5 }
 0x102   :  { %1723 = vmatpush3.bf16.msra.mxu0 %v1722_v29 }
 0x103   :  { %1724 = vmatprep.subr.bf16.mxu0 %v1909_v5 }
 0x106   :  { %1726 = vmatpush3.bf16.msra.mxu0 %v1725_v32  ;;  %v497_v32 = vsub.s32 3, %v2172_v43 }
 0x107   :  { %1727 = vmatprep.subr.bf16.mxu0 %v1909_v5 }
 0x108   :  { %v498_v34 = vrot.slane %v2201_v60, %v497_v32 }
 0x10a   :  { %1729 = vmatpush3.bf16.msra.mxu0 %v1728_v35  ;;  %v2251_v35 = vrot.slane %v2201_v60, %v682_v33 }
 0x10b   :  { %1730 = vmatprep.subr.bf16.mxu0 %v1909_v5 }
 0x10e   :  { %1732 = vmatpush3.bf16.msra.mxu0 %v1731_v38 }
 0x10f   :  { %1733 = vmatprep.subr.bf16.mxu0 %v1909_v5 }
 0x112   :  { %1735 = vmatpush3.bf16.msra.mxu0 %v1734_v42 }
 0x113   :  { %1736 = vmatprep.subr.bf16.mxu0 %v1909_v5 }
 0x116   :  { %1738 = vmatpush3.bf16.msra.mxu0 %v1737_v56 }
 0x117   :  { %1745 = vmatprep.subr.bf16.mxu0 %v1909_v5 }
 0x1cc   :  { %v379_v48 = vpop.f32.mrb[0].mxu0 }
 0x1cd   :  { %v380_v49 = vadd.f32 %v379_v48, %v308_v47  ;;  %v1532_v50 = vpop.f32.mrb[1].mxu0 }
 0x1ce   :  { %v2262_v50 = vld [vmem:[%s2414_s8] sm:$0xff] }
 0x1cf   :  { %v384_v51 = vmul.f32 0.02, %v380_v49  ;;  %vm383_vm1 = vcmp.ge.f32.partialorder %v380_v49, 0.0 }
 0x1d1   :  { %v385_v10 = vsel %vm383_vm1, %v380_v49, %v384_v51  ;;  %v2267_v51 = vld [vmem:[%s2414_s8 + $0x8] sm:$0xff] }
 0x1d2   :  { %1566 = vmatmul.mubr.f32.vlgmr.msra.gmra.mrb[0].mxu1 %v385_v10  ;;  %v1746_v10 = vpack.c.bf16 %v2267_v51, %v2262_v50 }
 0x1d3   :  { %1604 = vmatpush3.msk.msra.mxu1 %vm579_vm5, %v570_v52  ;;  %1605 = vmatprep.mubr.msk.f32.mxu1 %vm1910_vm0, %v1911_v8  ;;  %v2272_v52 = vld [vmem:[%s2414_s8 + $0x10] sm:$0xff] }
 0x1d4   :  { %1739 = vmatprep.subr.bf16.mxu1 %v1909_v5 }
 0x1d6   :  { %1606 = vmatmul.mubr.msk.f32.vlgmr.msra.gmra.mrb[2].mxu1 %vm575_vm6, %v569_v53  ;;  %v2279_v53 = vld [vmem:[%s2414_s8 + $0x18] sm:$0xff]  ;;  %s1918_s8 = smov 96  }
 0x1d7   :  { %1616 = vmatprep.mubr.msk.f32.mxu1 %vm1910_vm0, %v1911_v8  ;;  %1741 = vmatpush3.bf16.msra.mxu1 %v1740_v18  ;;  %v1749_v54 = vpack.c.bf16 %v2279_v53, %v2272_v52 }
 0x1d8   :  { %1742 = vmatprep.subr.bf16.mxu1 %v1909_v5 }
 0x1db   :  { %1744 = vmatpush3.bf16.msra.mxu1 %v1743_v20 }
 0x1dc   :  { %1751 = vmatprep.subr.bf16.mxu1 %v1909_v5 }
 0x2a5   :  { %v472_v61 = vpop.f32.mrb[0].mxu1 }
 0x2a6   :  { %v473_v62 = vadd.f32 %v472_v61, %v405_v58  ;;  %v1567_v63 = vpop.f32.mrb[1].mxu1  ;;  %v773_v58 = vsub.s32 4, %v2172_v43 }
 0x2a8   :  { %vm476_vm7 = vcmp.ge.f32.partialorder %v473_v62, 0.0  ;;  %v477_v1 = vmul.f32 0.02, %v473_v62  ;;  %v2288_v61 = vrot.slane %v2201_v60, %v773_v58  ;;  %v2340_v58 = vpack.i.bf16 %v2267_v51, %v2262_v50 }
 0x2a9   :  { %v649_v2 = vpop.f32.mrb[2].mxu1 }
 0x2aa   :  { %v650_v3 = vadd.f32 %v649_v2, %v574_v0  ;;  %v1607_v4 = vpop.f32.mrb[3].mxu1  ;;  %v478_v6 = vsel %vm476_vm7, %v473_v62, %v477_v1  ;;  %v2291_v0 = vrot.slane %v2201_v60, %v778_v59  ;;  %v2346_v59 = vpack.i.bf16 %v2279_v53, %v2272_v52 }
 0x2ab   :  { %1601 = vmatmul.mubr.f32.vlgmr.msra.gmra.mrb[2].mxu0 %v478_v6  ;;  %v786_v6 = vsub.s32 6, %v2172_v43 }
 0x2ac   :  { %v653_v7 = vsel %vm309_vm4, %v650_v3, 0.0  ;;  %1627 = vmatprep.mubr.msk.f32.mxu0 %vm1910_vm0, %v1911_v8  ;;  %1747 = vmatpush3.bf16.msra.mxu0 %v1746_v10 }
 0x2ad   :  { %654 = vadd.xlane.f32.xlu0 %v653_v7  ;;  %1748 = vmatprep.subr.bf16.mxu0 %v1909_v5  ;;  %v2302_v7 = vrot.slane %v2201_v60, %v786_v6 }
 0x2b0   :  { %1750 = vmatpush3.bf16.msra.mxu0 %v1749_v54 }
 0x2b1   :  { %1757 = vmatprep.subr.bf16.mxu0 %v1909_v5 }
 0x2c3   :  { %875 = vrot.lane.b32.xlu0 %v2237_v24, %s1918_s8 }
 0x33a   :  { %v655_v9 = vpop.xlane.xlu0 %654 }
 0x33b   :  { %v657_v11 = vmul.f32 0.03125, %v655_v9 }
 0x33d   :  { %v658_v46 = vsub.f32 %v650_v3, %v657_v11 }
 0x33f   :  { %v659_v12 = vmul.f32 %v658_v46, %v658_v46 }
 0x341   :  { %v660_v13 = vsel %vm309_vm4, %v659_v12, 0.0 }
 0x342   :  { %661 = vadd.xlane.f32.xlu1 %v660_v13  ;;  %v2308_v13 = vpack.i.bf16 %v2216_v15, %v2211_v14  ;;  %v2318_v14 = vpack.i.bf16 %v2228_v19, %v2221_v17  ;;  %v876_v19 = vpop.permute.xlu0 %875 }
 0x37e   :  { %v565_v41 = vpop.f32.mrb[2].mxu0 }
 0x37f   :  { %v1602_v21 = vpop.f32.mrb[3].mxu0  ;;  %v2253_v37 = vadd.f32 %v565_v41, %v498_v34 }
 0x3cf   :  { %v662_v16 = vpop.xlane.xlu1 %661 }
 0x3d0   :  { %v663_v22 = vmul.f32 0.03125, %v662_v16 }
 0x3d2   :  { %v664_v23 = vadd.f32 1e-05, %v663_v22 }
 0x3d4   :  { %1846 = vrsqrt.f32 %v664_v23 }
 0x3de   :  { %v1847_v25 = vpop.eup %1846 }
 0x3df   :  { %v666_v27 = vmul.f32 %v1847_v25, %v658_v46 }
 0x3e1   :  { %v671_v28 = vmul.f32 %v2237_v24, %v666_v27 }
 0x3e3   :  { %v676_v29 = vadd.f32 %v2240_v26, %v671_v28 }
 0x3e5   :  { %vm677_vm8 = vcmp.ge.f32.partialorder %v676_v29, 0.0  ;;  %v678_v30 = vmul.f32 0.02, %v676_v29 }
 0x3e7   :  { %v679_v31 = vsel %vm677_vm8, %v676_v29, %v678_v30 }
 0x3e8   :  { %1617 = vmatmul.mubr.msk.f32.vlgmr.msra.gmra.mrb[4].mxu1 %vm309_vm4, %v679_v31 }
 0x3e9   :  { %1638 = vmatprep.mubr.msk.f32.mxu1 %vm1910_vm0, %v1911_v8 }
 0x4bb   :  { %v753_v36 = vpop.f32.mrb[4].mxu1 }
 0x4bc   :  { %v754_v38 = vadd.f32 %v753_v36, %v2251_v35  ;;  %v1618_v39 = vpop.f32.mrb[5].mxu1 }
 0x4be   :  { %v757_v40 = vadd.f32 %v754_v38, %v2253_v37 }
 0x4c0   :  { %v758_v42 = vsel %vm309_vm4, %v757_v40, 0.0 }
 0x4c1   :  { %759 = vadd.xlane.f32.xlu1 %v758_v42 }
 0x54e   :  { %v760_v44 = vpop.xlane.xlu1 %759 }
 0x54f   :  { %v761_v45 = vmul.f32 0.03125, %v760_v44 }
 0x551   :  { %v762_v47 = vsub.f32 %v757_v40, %v761_v45 }
 0x553   :  { %v763_v48 = vmul.f32 %v762_v47, %v762_v47 }
 0x555   :  { %v764_v49 = vsel %vm309_vm4, %v763_v48, 0.0 }
 0x556   :  { %765 = vadd.xlane.f32.xlu1 %v764_v49 }
 0x5e3   :  { %v766_v55 = vpop.xlane.xlu1 %765 }
 0x5e4   :  { %v767_v56 = vmul.f32 0.03125, %v766_v55 }
 0x5e6   :  { %v768_v57 = vadd.f32 1e-05, %v767_v56 }
 0x5e8   :  { %1848 = vrsqrt.f32 %v768_v57 }
 0x5f2   :  { %v1849_v62 = vpop.eup %1848 }
 0x5f3   :  { %v770_v63 = vmul.f32 %v1849_v62, %v762_v47 }
 0x5f5   :  { %v775_v1 = vmul.f32 %v2288_v61, %v770_v63 }
 0x5f7   :  { %v780_v2 = vadd.f32 %v2291_v0, %v775_v1 }
 0x5f9   :  { %vm781_vm9 = vcmp.ge.f32.partialorder %v780_v2, 0.0  ;;  %v782_v3 = vmul.f32 0.02, %v780_v2 }
 0x5fb   :  { %v783_v4 = vsel %vm781_vm9, %v780_v2, %v782_v3 }
 0x5fc   :  { %1628 = vmatmul.mubr.msk.f32.vlgmr.msra.gmra.mrb[4].mxu0 %vm309_vm4, %v783_v4 }
 0x5fd   :  { %1649 = vmatprep.mubr.msk.f32.mxu0 %vm1910_vm0, %v1911_v8 }
 0x6cf   :  { %v857_v9 = vpop.f32.mrb[4].mxu0 }
 0x6d0   :  { %v858_v11 = vadd.f32 %v857_v9, %v2302_v7  ;;  %v1629_v46 = vpop.f32.mrb[5].mxu0 }
 0x6d2   :  { %v861_v12 = vsel %vm309_vm4, %v858_v11, 0.0 }
 0x6d3   :  { %862 = vadd.xlane.f32.xlu1 %v861_v12 }
 0x6e4   :  { %1801 = vrot.lane.b32.xlu1 %v2308_v13, %s1918_s8 }
 0x6e8   :  { %880 = vrot.lane.b32.xlu1 %v2240_v26, %s1918_s8 }
 0x760   :  { %v863_v43 = vpop.xlane.xlu1 %862 }
 0x761   :  { %v864_v60 = vmul.f32 0.03125, %v863_v43 }
 0x763   :  { %v865_v18 = vsub.f32 %v858_v11, %v864_v60 }
 0x764   :  { %v1802_v20 = vpop.permute.xlu1 %1801 }
 0x765   :  { %v866_v41 = vmul.f32 %v865_v18, %v865_v18  ;;  %v1804_v21 = vunpack.i.h.bf16 %v1802_v20  ;;  %v1803_v16 = vunpack.i.l.bf16 %v1802_v20 }
 0x767   :  { %v867_v22 = vsel %vm309_vm4, %v866_v41, 0.0  ;;  %v1752_v23 = vpack.c.bf16 %v1804_v21, %v1803_v16 }
 0x768   :  { %868 = vadd.xlane.f32.xlu1 %v867_v22  ;;  %v881_v15 = vpop.permute.xlu1 %880 }
 0x769   :  { %1753 = vmatpush3.bf16.msra.mxu1 %v1752_v23 }
 0x76a   :  { %1754 = vmatprep.subr.bf16.mxu1 %v1909_v5 }
 0x779   :  { %1806 = vrot.lane.b32.xlu1 %v2318_v14, %s1918_s8 }
 0x77d   :  { %904 = vrot.lane.b32.xlu1 %v2251_v35, %s1918_s8 }
 0x781   :  { %981 = vrot.lane.b32.xlu1 %v2253_v37, %s1918_s8 }
 0x7f5   :  { %v869_v25 = vpop.xlane.xlu1 %868 }
 0x7f6   :  { %v870_v27 = vmul.f32 0.03125, %v869_v25 }
 0x7f8   :  { %v871_v28 = vadd.f32 1e-05, %v870_v27 }
 0x7f9   :  { %v1807_v29 = vpop.permute.xlu1 %1806 }
 0x7fa   :  { %1850 = vrsqrt.f32 %v871_v28  ;;  %v1809_v30 = vunpack.i.h.bf16 %v1807_v29  ;;  %v1808_v31 = vunpack.i.l.bf16 %v1807_v29 }
 0x7fc   :  { %v1755_v32 = vpack.c.bf16 %v1809_v30, %v1808_v31 }
 0x7fd   :  { %v905_v40 = vpop.permute.xlu1 %904 }
 0x7fe   :  { %1756 = vmatpush3.bf16.msra.mxu1 %v1755_v32 }
 0x7ff   :  { %1763 = vmatprep.subr.bf16.mxu1 %v1909_v5 }
 0x801   :  { %v982_v47 = vpop.permute.xlu1 %981 }
 0x804   :  { %v1851_v17 = vpop.eup %1850 }
 0x805   :  { %v873_v33 = vmul.f32 %v1851_v17, %v865_v18 }
 0x807   :  { %v878_v34 = vmul.f32 %v876_v19, %v873_v33 }
 0x809   :  { %v883_v36 = vadd.f32 %v881_v15, %v878_v34 }
 0x80b   :  { %vm884_vm10 = vcmp.ge.f32.partialorder %v883_v36, 0.0  ;;  %v885_v38 = vmul.f32 0.02, %v883_v36 }
 0x80d   :  { %v886_v39 = vsel %vm884_vm10, %v883_v36, %v885_v38 }
 0x80e   :  { %1639 = vmatmul.mubr.msk.f32.vlgmr.msra.gmra.mrb[6].mxu1 %vm309_vm4, %v886_v39 }
 0x80f   :  { %1660 = vmatprep.mubr.msk.f32.mxu1 %vm1910_vm0, %v1911_v8 }
 0x8e1   :  { %v976_v42 = vpop.f32.mrb[6].mxu1 }
 0x8e2   :  { %v977_v44 = vadd.f32 %v976_v42, %v905_v40  ;;  %v1640_v45 = vpop.f32.mrb[7].mxu1 }
 0x8e4   :  { %v984_v48 = vadd.f32 %v982_v47, %v977_v44 }
 0x8e6   :  { %v985_v49 = vsel %vm309_vm4, %v984_v48, 0.0 }
 0x8e7   :  { %986 = vadd.xlane.f32.xlu1 %v985_v49 }
 0x8f8   :  { %999 = vrot.lane.b32.xlu1 %v2288_v61, %s1918_s8 }
 0x8fc   :  { %1004 = vrot.lane.b32.xlu1 %v2291_v0, %s1918_s8 }
 0x900   :  { %1028 = vrot.lane.b32.xlu1 %v2302_v7, %s1918_s8 }
 0x904   :  { %1117 = vrot.lane.b32.xlu1 %v2237_v24, %s1919_s29 }
 0x974   :  { %v987_v10 = vpop.xlane.xlu1 %986 }
 0x975   :  { %v988_v54 = vmul.f32 0.03125, %v987_v10 }
 0x977   :  { %v989_v55 = vsub.f32 %v984_v48, %v988_v54 }
 0x978   :  { %v1000_v11 = vpop.permute.xlu1 %999 }
 0x979   :  { %v990_v56 = vmul.f32 %v989_v55, %v989_v55 }
 0x97b   :  { %v991_v57 = vsel %vm309_vm4, %v990_v56, 0.0 }
 0x97c   :  { %992 = vadd.xlane.f32.xlu0 %v991_v57  ;;  %v1005_v12 = vpop.permute.xlu1 %1004 }
 0x980   :  { %v1029_v41 = vpop.permute.xlu1 %1028 }
 0x992   :  { %1811 = vrot.lane.b32.xlu0 %v2340_v58, %s1918_s8 }
 0x996   :  { %1816 = vrot.lane.b32.xlu0 %v2346_v59, %s1918_s8 }
 0xa09   :  { %v993_v62 = vpop.xlane.xlu0 %992 }
 0xa0a   :  { %v994_v63 = vmul.f32 0.03125, %v993_v62 }
 0xa0c   :  { %v995_v1 = vadd.f32 1e-05, %v994_v63 }
 0xa0d   :  { %v1812_v2 = vpop.permute.xlu0 %1811 }
 0xa0e   :  { %1852 = vrsqrt.f32 %v995_v1  ;;  %v1814_v3 = vunpack.i.h.bf16 %v1812_v2  ;;  %v1813_v4 = vunpack.i.l.bf16 %v1812_v2 }
 0xa10   :  { %v1758_v6 = vpack.c.bf16 %v1814_v3, %v1813_v4 }
 0xa11   :  { %v1817_v50 = vpop.permute.xlu0 %1816 }
 0xa12   :  { %v1819_v51 = vunpack.i.h.bf16 %v1817_v50  ;;  %v1818_v9 = vunpack.i.l.bf16 %v1817_v50  ;;  %1759 = vmatpush3.bf16.msra.mxu0 %v1758_v6 }
 0xa13   :  { %1760 = vmatprep.subr.bf16.mxu0 %v1909_v5 }
 0xa14   :  { %v1761_v52 = vpack.c.bf16 %v1819_v51, %v1818_v9 }
 0xa16   :  { %1762 = vmatpush3.bf16.msra.mxu0 %v1761_v52 }
 0xa17   :  { %1769 = vmatprep.subr.bf16.mxu0 %v1909_v5 }
 0xa18   :  { %v1853_v53 = vpop.eup %1852 }
 0xa19   :  { %v997_v46 = vmul.f32 %v1853_v53, %v989_v55 }
 0xa1b   :  { %v1002_v43 = vmul.f32 %v1000_v11, %v997_v46 }
 0xa1d   :  { %v1007_v60 = vadd.f32 %v1005_v12, %v1002_v43 }
 0xa1f   :  { %vm1008_vm11 = vcmp.ge.f32.partialorder %v1007_v60, 0.0  ;;  %v1009_v18 = vmul.f32 0.02, %v1007_v60 }
 0xa21   :  { %v1010_v20 = vsel %vm1008_vm11, %v1007_v60, %v1009_v18 }
 0xa22   :  { %1650 = vmatmul.mubr.msk.f32.vlgmr.msra.gmra.mrb[6].mxu0 %vm309_vm4, %v1010_v20 }
 0xa23   :  { %1671 = vmatprep.mubr.msk.f32.mxu0 %vm1910_vm0, %v1911_v8 }
 0xaf5   :  { %v1100_v21 = vpop.f32.mrb[6].mxu0 }
 0xaf6   :  { %v1101_v16 = vadd.f32 %v1100_v21, %v1029_v41  ;;  %v1651_v22 = vpop.f32.mrb[7].mxu0  ;;  %v1338_v41 = vld [vmem:[%s2416_s10 + $0x18] sm:$0xff] }
 0xaf8   :  { %v1104_v23 = vsel %vm309_vm4, %v1101_v16, 0.0 }
 0xaf9   :  { %1105 = vadd.xlane.f32.xlu0 %v1104_v23 }
 0xb0f   :  { %1821 = vrot.lane.b32.xlu0 %v2308_v13, %s1919_s29 }
 0xb13   :  { %1121 = vrot.lane.b32.xlu0 %v2240_v26, %s1919_s29 }
 0xb17   :  { %1140 = vrot.lane.b32.xlu0 %v2251_v35, %s1919_s29  ;;  %v1118_v35 = vpop.permute.xlu1 %1117 }
 0xb86   :  { %v1106_v15 = vpop.xlane.xlu0 %1105 }
 0xb87   :  { %v1107_v25 = vmul.f32 0.03125, %v1106_v15 }
 0xb89   :  { %v1108_v27 = vsub.f32 %v1101_v16, %v1107_v25 }
 0xb8a   :  { %v1822_v13 = vpop.permute.xlu0 %1821 }
 0xb8b   :  { %v1109_v24 = vmul.f32 %v1108_v27, %v1108_v27  ;;  %v1824_v29 = vunpack.i.h.bf16 %v1822_v13  ;;  %v1823_v30 = vunpack.i.l.bf16 %v1822_v13 }
 0xb8d   :  { %v1110_v28 = vsel %vm309_vm4, %v1109_v24, 0.0  ;;  %v1764_v26 = vpack.c.bf16 %v1824_v29, %v1823_v30  ;;  %v1444_v24 = vld [vmem:[#allocation4] ss:$0 sm:$0xff] }
 0xb8e   :  { %1111 = vadd.xlane.f32.xlu1 %v1110_v28  ;;  %v1122_v38 = vpop.permute.xlu0 %1121 }
 0xb8f   :  { %1765 = vmatpush3.bf16.msra.mxu1 %v1764_v26 }
 0xb90   :  { %1766 = vmatprep.subr.bf16.mxu1 %v1909_v5 }
 0xb92   :  { %v1141_v44 = vpop.permute.xlu0 %1140 }
 0xb9f   :  { %1826 = vrot.lane.b32.xlu1 %v2318_v14, %s1919_s29 }
 0xba3   :  { %1216 = vrot.lane.b32.xlu1 %v2253_v37, %s1919_s29 }
 0xba7   :  { %1233 = vrot.lane.b32.xlu1 %v2288_v61, %s1919_s29 }
 0xc1b   :  { %v1112_v31 = vpop.xlane.xlu1 %1111 }
 0xc1c   :  { %v1113_v32 = vmul.f32 0.03125, %v1112_v31 }
 0xc1e   :  { %v1114_v17 = vadd.f32 1e-05, %v1113_v32 }
 0xc1f   :  { %v1827_v19 = vpop.permute.xlu1 %1826 }
 0xc20   :  { %1854 = vrsqrt.f32 %v1114_v17  ;;  %v1829_v14 = vunpack.i.h.bf16 %v1827_v19  ;;  %v1828_v33 = vunpack.i.l.bf16 %v1827_v19 }
 0xc22   :  { %v1767_v34 = vpack.c.bf16 %v1829_v14, %v1828_v33 }
 0xc23   :  { %v1217_v49 = vpop.permute.xlu1 %1216 }
 0xc24   :  { %1768 = vmatpush3.bf16.msra.mxu1 %v1767_v34 }
 0xc25   :  { %1775 = vmatprep.subr.bf16.mxu1 %v1909_v5 }
 0xc2a   :  { %v1855_v37 = vpop.eup %1854 }
 0xc2b   :  { %v1116_v36 = vmul.f32 %v1855_v37, %v1108_v27 }
 0xc2d   :  { %v1120_v39 = vmul.f32 %v1118_v35, %v1116_v36 }
 0xc2f   :  { %v1124_v61 = vadd.f32 %v1122_v38, %v1120_v39 }
 0xc31   :  { %vm1125_vm12 = vcmp.ge.f32.partialorder %v1124_v61, 0.0  ;;  %v1126_v40 = vmul.f32 0.02, %v1124_v61 }
 0xc33   :  { %v1127_v42 = vsel %vm1125_vm12, %v1124_v61, %v1126_v40 }
 0xc34   :  { %1661 = vmatmul.mubr.msk.f32.vlgmr.msra.gmra.mrb[8].mxu1 %vm309_vm4, %v1127_v42 }
 0xc35   :  { %1682 = vmatprep.mubr.msk.f32.mxu1 %vm1910_vm0, %v1911_v8 }
 0xd07   :  { %v1212_v45 = vpop.f32.mrb[8].mxu1 }
 0xd08   :  { %v1213_v47 = vadd.f32 %v1212_v45, %v1141_v44  ;;  %v1662_v48 = vpop.f32.mrb[9].mxu1 }
 0xd0a   :  { %v1219_v10 = vadd.f32 %v1217_v49, %v1213_v47 }
 0xd0c   :  { %v1220_v54 = vsel %vm309_vm4, %v1219_v10, 0.0 }
 0xd0d   :  { %1221 = vadd.xlane.f32.xlu0 %v1220_v54 }
 0xd23   :  { %1831 = vrot.lane.b32.xlu0 %v2340_v58, %s1919_s29 }
 0xd27   :  { %1237 = vrot.lane.b32.xlu0 %v2291_v0, %s1919_s29  ;;  %v1335_v0 = vld [vmem:[%s2416_s10] sm:$0xff] }
 0xd2b   :  { %1256 = vrot.lane.b32.xlu0 %v2302_v7, %s1919_s29  ;;  %v1336_v7 = vld [vmem:[%s2416_s10 + $0x8] sm:$0xff] }
 0xd2c   :  { %v1776_v3 = vpack.c.bf16 %v1336_v7, %v1335_v0 }
 0xd2e   :  { %1777 = vmatpush3.bf16.msra.mxu1 %v1776_v3 }
 0xd2f   :  { %1778 = vmatprep.subr.bf16.mxu1 %v1909_v5 }
 0xd9a   :  { %v1222_v55 = vpop.xlane.xlu0 %1221 }
 0xd9b   :  { %v1223_v8 = vmul.f32 0.03125, %v1222_v55 }
 0xd9d   :  { %v1224_v56 = vsub.f32 %v1219_v10, %v1223_v8 }
 0xd9e   :  { %v1832_v63 = vpop.permute.xlu0 %1831 }
 0xd9f   :  { %v1225_v57 = vmul.f32 %v1224_v56, %v1224_v56  ;;  %v1834_v1 = vunpack.i.h.bf16 %v1832_v63  ;;  %v1833_v2 = vunpack.i.l.bf16 %v1832_v63 }
 0xda1   :  { %v1226_v62 = vsel %vm309_vm4, %v1225_v57, 0.0  ;;  %v1770_v58 = vpack.c.bf16 %v1834_v1, %v1833_v2 }
 0xda2   :  { %1227 = vadd.xlane.f32.xlu1 %v1226_v62  ;;  %v1238_v12 = vpop.permute.xlu0 %1237 }
 0xda3   :  { %1771 = vmatpush3.bf16.msra.mxu0 %v1770_v58 }
 0xda4   :  { %1772 = vmatprep.subr.bf16.mxu0 %v1909_v5  ;;  %v1337_v5 = vld [vmem:[%s2416_s10 + $0x10] sm:$0xff] }
 0xda5   :  { %v1779_v21 = vpack.c.bf16 %v1338_v41, %v1337_v5 }
 0xda6   :  { %v1257_v16 = vpop.permute.xlu0 %1256 }
 0xda7   :  { %1780 = vmatpush3.bf16.msra.mxu1 %v1779_v21 }
 0xdb3   :  { %1836 = vrot.lane.b32.xlu1 %v2346_v59, %s1919_s29  ;;  %v1234_v59 = vpop.permute.xlu1 %1233 }
 0xe2f   :  { %v1228_v4 = vpop.xlane.xlu1 %1227 }
 0xe30   :  { %v1229_v6 = vmul.f32 0.03125, %v1228_v4 }
 0xe32   :  { %v1230_v50 = vadd.f32 1e-05, %v1229_v6 }
 0xe33   :  { %v1837_v51 = vpop.permute.xlu1 %1836 }
 0xe34   :  { %1856 = vrsqrt.f32 %v1230_v50  ;;  %v1839_v9 = vunpack.i.h.bf16 %v1837_v51  ;;  %v1838_v11 = vunpack.i.l.bf16 %v1837_v51 }
 0xe36   :  { %v1773_v52 = vpack.c.bf16 %v1839_v9, %v1838_v11 }
 0xe38   :  { %1774 = vmatpush3.bf16.msra.mxu0 %v1773_v52 }
 0xe3e   :  { %v1857_v53 = vpop.eup %1856 }
 0xe3f   :  { %v1232_v46 = vmul.f32 %v1857_v53, %v1224_v56 }
 0xe41   :  { %v1236_v43 = vmul.f32 %v1234_v59, %v1232_v46 }
 0xe43   :  { %v1240_v60 = vadd.f32 %v1238_v12, %v1236_v43 }
 0xe45   :  { %vm1241_vm0 = vcmp.ge.f32.partialorder %v1240_v60, 0.0  ;;  %v1242_v18 = vmul.f32 0.02, %v1240_v60 }
 0xe47   :  { %v1243_v20 = vsel %vm1241_vm0, %v1240_v60, %v1242_v18 }
 0xe48   :  { %1672 = vmatmul.mubr.msk.f32.vlgmr.msra.gmra.mrb[8].mxu0 %vm309_vm4, %v1243_v20 }
 0xf1b   :  { %v1328_v22 = vpop.f32.mrb[8].mxu0 }
 0xf1c   :  { %v1329_v23 = vadd.f32 %v1328_v22, %v1257_v16  ;;  %v1673_v15 = vpop.f32.mrb[9].mxu0 }
 0xf1e   :  { %vm1332_vm13 = vcmp.ge.f32.partialorder %v1329_v23, 0.0  ;;  %v1333_v25 = vmul.f32 0.02, %v1329_v23 }
 0xf20   :  { %v1334_v27 = vsel %vm1332_vm13, %v1329_v23, %v1333_v25 }
 0xf21   :  { %1683 = vmatmul.mubr.msk.f32.vlgmr.msra.gmra.mrb[10].mxu1 %vm309_vm4, %v1334_v27 }
 0xff4   :  { %v1415_v28 = vpop.f32.mrb[10].mxu1 }
 0xff5   :  { %v1416_v13 = vadd.f32 %v1444_v24, %v1415_v28  ;;  %v1684_v29 = vpop.f32.mrb[11].mxu1 }
 0xff7   :  { %1419 = vst.msk [vmem:[%s2418_s12] sm:$0xff] %vm575_vm6, %v1416_v13 }
 0xff8   :  { %1424 = vsyncpa [#allocation3], 1 }
 0xff9   :  { %1425 = vsyncpa [#allocation5], 1 }

// kernel: _forward_jit.1
= control target key start
LH: loop header
LB: loop body
LE: loop exit
PB: predicated region body
PF: predicated region fallthrough
CT: control target
= control target key end

     0   :  { %v1578_v0 = vmov 0.0|0.0   ;;  %vm1579_vm0 = vmmov 0   ;;  %v1580_v4 = vmov 0.0   ;;  %vm60_vm1 = vcmask 261120   ;;  %s2019_s2 = inlined_call_operand.vmem [shape: f32[32,128], index: 2, kind: input, shape index: {}]   ;;  %s2020_s4 = inlined_call_operand.vmem [shape: f32[128,128], index: 4, kind: input, shape index: {}]   ;;  %s2021_s1 = inlined_call_operand.vmem [shape: f32[8,32], index: 1, kind: input, shape index: {}]   ;;  %s2022_s6 = inlined_call_operand.vmem [shape: f32[128,96], index: 6, kind: input, shape index: {}]   ;;  %s2023_s3 = inlined_call_operand.vmem [shape: f32[2,128], index: 3, kind: input, shape index: {}]   ;;  %s2024_s5 = inlined_call_operand.vmem [shape: f32[4,32], index: 5, kind: input, shape index: {}]   ;;  %s2025_s0 = inlined_call_operand.vmem [shape: f32[8,4], index: 0, kind: input, shape index: {}]   ;;  %s2026_s9 = inlined_call_operand.vmem [shape: f32[8,96], index: 9, kind: input, shape index: {}]   ;;  %s2027_s7 = inlined_call_operand.vmem [shape: f32[32,96], index: 7, kind: input, shape index: {}]   ;;  %s2028_s8 = inlined_call_operand.vmem [shape: f32[32,96], index: 8, kind: input, shape index: {}]   ;;  %s2029_s10 = inlined_call_operand.vmem [shape: f32[32,4], index: 10, kind: input, shape index: {}]   ;;  %s2030_s11 = inlined_call_operand.vmem [shape: f32[1,4], index: 11, kind: input, shape index: {}]   ;;  %s2031_s12 = inlined_call_operand.vmem [shape: f32[8,4], index: 12, kind: output, shape index: {}]  }
   0x1   :  { %1425 = vmatprep.subr.bf16.mxu0 %v1578_v0  ;;  %v52_v1 = vld [vmem:[%s2019_s2] sm:$0xff]  ;;  %v53_v2 = vld [vmem:[%s2019_s2 + $0x8] sm:$0xff]  ;;  %v54_v3 = vld [vmem:[%s2019_s2 + $0x10] sm:$0xff]  ;;  %1270 = vmatprep.mubr.msk.f32.mxu0 %vm1579_vm0, %v1580_v4  ;;  %v56_v54 = vlaneseq  ;;  %vm330_vm3 = vcmask 1043456   ;;  %vm326_vm4 = vcmask 31744  }
   0x2   :  { %v1426_v5 = vpack.c.bf16 %v53_v2, %v52_v1  ;;  %v55_v6 = vld [vmem:[%s2019_s2 + $0x18] sm:$0xff]  ;;  %1431 = vmatprep.subr.bf16.mxu1 %v1578_v0  ;;  %v137_v7 = vld [vmem:[%s2020_s4] sm:$0xff]  ;;  %1305 = vmatprep.mubr.msk.f32.mxu1 %vm1579_vm0, %v1580_v4  ;;  %v138_v8 = vld [vmem:[%s2020_s4 + $0x8] sm:$0xff] }
   0x3   :  { %v139_v9 = vld [vmem:[%s2020_s4 + $0x10] sm:$0xff]  ;;  %v140_v10 = vld [vmem:[%s2020_s4 + $0x18] sm:$0xff]  ;;  %v1429_v11 = vpack.c.bf16 %v55_v6, %v54_v3  ;;  %v1432_v12 = vpack.c.bf16 %v138_v8, %v137_v7  ;;  %v141_v14 = vld [vmem:[%s2020_s4 + $0x20] sm:$0xff]  ;;  %v1779_v55 = vshrl.u32 %v56_v54, 7 }
   0x4   :  { %1427 = vmatpush3.bf16.msra.mxu0 %v1426_v5  ;;  %v1435_v13 = vpack.c.bf16 %v140_v10, %v139_v9  ;;  %v142_v15 = vld [vmem:[%s2020_s4 + $0x28] sm:$0xff]  ;;  %v51_v16 = vld [vmem:[%s2021_s1] sm:$0xff]  ;;  %v143_v18 = vld [vmem:[%s2020_s4 + $0x30] sm:$0xff] }
   0x5   :  { %1428 = vmatprep.subr.bf16.mxu0 %v1578_v0  ;;  %1433 = vmatpush3.bf16.msra.mxu1 %v1432_v12  ;;  %v1438_v17 = vpack.c.bf16 %v142_v15, %v141_v14  ;;  %v144_v19 = vld [vmem:[%s2020_s4 + $0x38] sm:$0xff]  ;;  %v145_v21 = vld [vmem:[%s2020_s4 + $0x40] sm:$0xff]  ;;  %v146_v22 = vld [vmem:[%s2020_s4 + $0x48] sm:$0xff]  ;;  %v58_v56 = vsub.s32 0, %v1779_v55  ;;  %v155_v7 = vsub.s32 1, %v1779_v55  ;;  %v324_v9 = vsub.s32 7, %v1779_v55 }
   0x6   :  { %1434 = vmatprep.subr.bf16.mxu1 %v1578_v0  ;;  %v1441_v20 = vpack.c.bf16 %v144_v19, %v143_v18  ;;  %v1444_v23 = vpack.c.bf16 %v146_v22, %v145_v21  ;;  %v147_v24 = vld [vmem:[%s2020_s4 + $0x50] sm:$0xff]  ;;  %v148_v25 = vld [vmem:[%s2020_s4 + $0x58] sm:$0xff]  ;;  %v149_v27 = vld [vmem:[%s2020_s4 + $0x60] sm:$0xff] }
   0x7   :  { %v1447_v26 = vpack.c.bf16 %v148_v25, %v147_v24  ;;  %v150_v28 = vld [vmem:[%s2020_s4 + $0x68] sm:$0xff]  ;;  %v151_v30 = vld [vmem:[%s2020_s4 + $0x70] sm:$0xff]  ;;  %v152_v31 = vld [vmem:[%s2020_s4 + $0x78] sm:$0xff]  ;;  %s1582_s4 = smov 64  }
   0x8   :  { %1430 = vmatpush3.bf16.msra.mxu0 %v1429_v11  ;;  %v1450_v29 = vpack.c.bf16 %v150_v28, %v149_v27  ;;  %v1453_v32 = vpack.c.bf16 %v152_v31, %v151_v30  ;;  %v230_v33 = vld [vmem:[%s2022_s6] sm:$0xff]  ;;  %v231_v34 = vld [vmem:[%s2022_s6 + $0x8] sm:$0xff]  ;;  %v232_v35 = vld [vmem:[%s2022_s6 + $0x10] sm:$0xff] }
   0x9   :  { %1455 = vmatprep.subr.bf16.mxu0 %v1578_v0  ;;  %1436 = vmatpush3.bf16.msra.mxu1 %v1435_v13  ;;  %v1456_v36 = vpack.c.bf16 %v231_v34, %v230_v33  ;;  %v233_v37 = vld [vmem:[%s2022_s6 + $0x18] sm:$0xff]  ;;  %v234_v39 = vld [vmem:[%s2022_s6 + $0x20] sm:$0xff]  ;;  %v235_v40 = vld [vmem:[%s2022_s6 + $0x28] sm:$0xff] }
   0xa   :  { %1437 = vmatprep.subr.bf16.mxu1 %v1578_v0  ;;  %v1459_v38 = vpack.c.bf16 %v233_v37, %v232_v35  ;;  %v1462_v41 = vpack.c.bf16 %v235_v40, %v234_v39  ;;  %v236_v42 = vld [vmem:[%s2022_s6 + $0x30] sm:$0xff]  ;;  %v237_v43 = vld [vmem:[%s2022_s6 + $0x38] sm:$0xff]  ;;  %v238_v45 = vld [vmem:[%s2022_s6 + $0x40] sm:$0xff] }
   0xb   :  { %1271 = vmatmul.mubr.msk.f32.vlgmr.msra.gmra.mrb[0].mxu0 %vm60_vm1, %v51_v16  ;;  %v1465_v44 = vpack.c.bf16 %v237_v43, %v236_v42  ;;  %v239_v46 = vld [vmem:[%s2022_s6 + $0x48] sm:$0xff]  ;;  %v240_v48 = vld [vmem:[%s2022_s6 + $0x50] sm:$0xff]  ;;  %v241_v49 = vld [vmem:[%s2022_s6 + $0x58] sm:$0xff] }
   0xc   :  { %1340 = vmatprep.mubr.msk.f32.mxu0 %vm1579_vm0, %v1580_v4  ;;  %1457 = vmatpush3.bf16.msra.mxu0 %v1456_v36  ;;  %v1468_v47 = vpack.c.bf16 %v239_v46, %v238_v45  ;;  %v1471_v50 = vpack.c.bf16 %v241_v49, %v240_v48  ;;  %v242_v51 = vld [vmem:[%s2022_s6 + $0x60] sm:$0xff]  ;;  %v243_v52 = vld [vmem:[%s2022_s6 + $0x68] sm:$0xff]  ;;  %v244_v3 = vld [vmem:[%s2022_s6 + $0x70] sm:$0xff]  ;;  %v248_v45 = vsub.s32 3, %v1779_v55  ;;  %v433_v46 = vsub.s32 2, %v1779_v55 }
   0xd   :  { %1439 = vmatpush3.bf16.msra.mxu1 %v1438_v17  ;;  %1458 = vmatprep.subr.bf16.mxu0 %v1578_v0  ;;  %v1474_v53 = vpack.c.bf16 %v243_v52, %v242_v51  ;;  %v41_v57 = vld [vmem:[%s2023_s3] sm:$0x3]  ;;  %v245_v5 = vld [vmem:[%s2022_s6 + $0x78] sm:$0xff]  ;;  %v1826_v27 = vld [vmem:[%s2027_s7 + $0x8] sm:$0xff] }
   0xe   :  { %1440 = vmatprep.subr.bf16.mxu1 %v1578_v0  ;;  %v59_v58 = vrot.slane %v41_v57, %v58_v56  ;;  %v321_v63 = vld [vmem:[%s2024_s5] sm:$0xf]  ;;  %v1477_v6 = vpack.c.bf16 %v245_v5, %v244_v3  ;;  %v156_v8 = vrot.slane %v41_v57, %v155_v7  ;;  %v1838_v30 = vld [vmem:[%s2027_s7 + $0x18] sm:$0xff] }
   0xf   :  { %v320_v2 = vld [vmem:[%s2025_s0] sm:$0xff] }
  0x10   :  { %1460 = vmatpush3.bf16.msra.mxu0 %v1459_v38  ;;  %v1811_v10 = vld [vmem:[%s2026_s9] sm:$0xff] }
  0x11   :  { %1442 = vmatpush3.bf16.msra.mxu1 %v1441_v20  ;;  %1461 = vmatprep.subr.bf16.mxu0 %v1578_v0  ;;  %v325_v14 = vrot.slane %v1811_v10, %v324_v9  ;;  %v1847_v37 = vrot.slane %v1811_v10, %v58_v56  ;;  %v1850_v39 = vrot.slane %v1811_v10, %v155_v7  ;;  %v529_v9 = vsub.s32 5, %v1779_v55 }
  0x12   :  { %1443 = vmatprep.subr.bf16.mxu1 %v1578_v0  ;;  %v1861_v48 = vrot.slane %v1811_v10, %v433_v46 }
  0x14   :  { %1463 = vmatpush3.bf16.msra.mxu0 %v1462_v41 }
  0x15   :  { %1445 = vmatpush3.bf16.msra.mxu1 %v1444_v23  ;;  %1464 = vmatprep.subr.bf16.mxu0 %v1578_v0 }
  0x16   :  { %1446 = vmatprep.subr.bf16.mxu1 %v1578_v0 }
  0x18   :  { %1466 = vmatpush3.bf16.msra.mxu0 %v1465_v44 }
  0x19   :  { %1448 = vmatpush3.bf16.msra.mxu1 %v1447_v26  ;;  %1467 = vmatprep.subr.bf16.mxu0 %v1578_v0  ;;  %v1821_v26 = vld [vmem:[%s2027_s7] sm:$0xff] }
  0x1a   :  { %1449 = vmatprep.subr.bf16.mxu1 %v1578_v0  ;;  %v1480_v28 = vpack.c.bf16 %v1826_v27, %v1821_v26 }
  0x1c   :  { %1469 = vmatpush3.bf16.msra.mxu0 %v1468_v47  ;;  %v249_v47 = vrot.slane %v1811_v10, %v248_v45 }
  0x1d   :  { %1451 = vmatpush3.bf16.msra.mxu1 %v1450_v29  ;;  %1470 = vmatprep.subr.bf16.mxu0 %v1578_v0  ;;  %v1833_v29 = vld [vmem:[%s2027_s7 + $0x10] sm:$0xff] }
  0x1e   :  { %1452 = vmatprep.subr.bf16.mxu1 %v1578_v0  ;;  %v1483_v31 = vpack.c.bf16 %v1838_v30, %v1833_v29 }
  0x20   :  { %1472 = vmatpush3.bf16.msra.mxu0 %v1471_v50 }
  0x21   :  { %1454 = vmatpush3.bf16.msra.mxu1 %v1453_v32  ;;  %1473 = vmatprep.subr.bf16.mxu0 %v1578_v0 }
  0x22   :  { %1343 = vmatprep.subr.mxu1 %v1580_v4 }
  0x24   :  { %1475 = vmatpush3.bf16.msra.mxu0 %v1474_v53 }
  0x25   :  { %1476 = vmatprep.subr.bf16.mxu0 %v1578_v0 }
  0x28   :  { %1478 = vmatpush3.bf16.msra.mxu0 %v1477_v6 }
  0x29   :  { %1485 = vmatprep.subr.bf16.mxu0 %v1578_v0 }
  0xde   :  { %v130_v59 = vpop.f32.mrb[0].mxu0 }
  0xdf   :  { %v131_v60 = vadd.f32 %v130_v59, %v59_v58  ;;  %v1272_v61 = vpop.f32.mrb[1].mxu0 }
  0xe0   :  { %v1872_v61 = vld [vmem:[%s2028_s8] sm:$0xff] }
  0xe1   :  { %v135_v62 = vmul.f32 0.02, %v131_v60  ;;  %vm134_vm2 = vcmp.ge.f32.partialorder %v131_v60, 0.0 }
  0xe3   :  { %v136_v1 = vsel %vm134_vm2, %v131_v60, %v135_v62  ;;  %v1877_v62 = vld [vmem:[%s2028_s8 + $0x8] sm:$0xff] }
  0xe4   :  { %1306 = vmatmul.mubr.f32.vlgmr.msra.gmra.mrb[0].mxu1 %v136_v1  ;;  %v1884_v1 = vld [vmem:[%s2028_s8 + $0x10] sm:$0xff] }
  0xe5   :  { %1344 = vmatpush3.msk.msra.mxu1 %vm330_vm3, %v321_v63  ;;  %1345 = vmatprep.mubr.msk.f32.mxu1 %vm1579_vm0, %v1580_v4  ;;  %v1486_v63 = vpack.c.bf16 %v1877_v62, %v1872_v61 }
  0xe6   :  { %1479 = vmatprep.subr.bf16.mxu1 %v1578_v0 }
  0xe8   :  { %1346 = vmatmul.mubr.msk.f32.vlgmr.msra.gmra.mrb[2].mxu1 %vm326_vm4, %v320_v2  ;;  %v1889_v2 = vld [vmem:[%s2028_s8 + $0x18] sm:$0xff]  ;;  %s1581_s8 = smov 96  }
  0xe9   :  { %1356 = vmatprep.mubr.msk.f32.mxu1 %vm1579_vm0, %v1580_v4  ;;  %1481 = vmatpush3.bf16.msra.mxu1 %v1480_v28  ;;  %v1489_v3 = vpack.c.bf16 %v1889_v2, %v1884_v1 }
  0xea   :  { %1482 = vmatprep.subr.bf16.mxu1 %v1578_v0 }
  0xed   :  { %1484 = vmatpush3.bf16.msra.mxu1 %v1483_v31 }
  0xee   :  { %1491 = vmatprep.subr.bf16.mxu1 %v1578_v0 }
 0x1b7   :  { %v223_v11 = vpop.f32.mrb[0].mxu1 }
 0x1b8   :  { %v224_v12 = vadd.f32 %v223_v11, %v156_v8  ;;  %v1307_v13 = vpop.f32.mrb[1].mxu1  ;;  %v524_v8 = vsub.s32 4, %v1779_v55 }
 0x1ba   :  { %vm227_vm5 = vcmp.ge.f32.partialorder %v224_v12, 0.0  ;;  %v228_v15 = vmul.f32 0.02, %v224_v12  ;;  %v1898_v11 = vrot.slane %v1811_v10, %v524_v8 }
 0x1bb   :  { %v400_v16 = vpop.f32.mrb[2].mxu1 }
 0x1bc   :  { %v401_v17 = vadd.f32 %v400_v16, %v325_v14  ;;  %v1347_v18 = vpop.f32.mrb[3].mxu1  ;;  %v229_v19 = vsel %vm227_vm5, %v224_v12, %v228_v15  ;;  %v1901_v14 = vrot.slane %v1811_v10, %v529_v9 }
 0x1bd   :  { %1341 = vmatmul.mubr.f32.vlgmr.msra.gmra.mrb[2].mxu0 %v229_v19  ;;  %v537_v19 = vsub.s32 6, %v1779_v55 }
 0x1be   :  { %v404_v20 = vsel %vm60_vm1, %v401_v17, 0.0  ;;  %1367 = vmatprep.mubr.msk.f32.mxu0 %vm1579_vm0, %v1580_v4  ;;  %1487 = vmatpush3.bf16.msra.mxu0 %v1486_v63  ;;  %v1945_v63 = vpack.i.bf16 %v1877_v62, %v1872_v61  ;;  %v1956_v61 = vpack.i.bf16 %v1889_v2, %v1884_v1 }
 0x1bf   :  { %405 = vadd.xlane.f32.xlu0 %v404_v20  ;;  %1488 = vmatprep.subr.bf16.mxu0 %v1578_v0  ;;  %v1914_v20 = vrot.slane %v1811_v10, %v537_v19 }
 0x1c2   :  { %1490 = vmatpush3.bf16.msra.mxu0 %v1489_v3 }
 0x1c3   :  { %1497 = vmatprep.subr.bf16.mxu0 %v1578_v0 }
 0x24c   :  { %v406_v21 = vpop.xlane.xlu0 %405 }
 0x24d   :  { %v408_v22 = vmul.f32 0.03125, %v406_v21 }
 0x24f   :  { %v409_v23 = vsub.f32 %v401_v17, %v408_v22 }
 0x251   :  { %v410_v24 = vmul.f32 %v409_v23, %v409_v23 }
 0x253   :  { %v411_v25 = vsel %vm60_vm1, %v410_v24, 0.0 }
 0x254   :  { %412 = vadd.xlane.f32.xlu0 %v411_v25  ;;  %v1920_v25 = vpack.i.bf16 %v1826_v27, %v1821_v26 }
 0x290   :  { %v316_v32 = vpop.f32.mrb[2].mxu0 }
 0x291   :  { %v1342_v33 = vpop.f32.mrb[3].mxu0  ;;  %v1863_v50 = vadd.f32 %v316_v32, %v249_v47 }
 0x292   :  { %v1929_v33 = vpack.i.bf16 %v1838_v30, %v1833_v29 }
 0x2e1   :  { %v413_v34 = vpop.xlane.xlu0 %412 }
 0x2e2   :  { %v414_v35 = vmul.f32 0.03125, %v413_v34 }
 0x2e4   :  { %v415_v36 = vadd.f32 1e-05, %v414_v35 }
 0x2e6   :  { %1566 = vrsqrt.f32 %v415_v36 }
 0x2f0   :  { %v1567_v38 = vpop.eup %1566 }
 0x2f1   :  { %v417_v40 = vmul.f32 %v1567_v38, %v409_v23 }
 0x2f3   :  { %v422_v41 = vmul.f32 %v1847_v37, %v417_v40 }
 0x2f5   :  { %v427_v42 = vadd.f32 %v1850_v39, %v422_v41 }
 0x2f7   :  { %vm428_vm6 = vcmp.ge.f32.partialorder %v427_v42, 0.0  ;;  %v429_v43 = vmul.f32 0.02, %v427_v42 }
 0x2f9   :  { %v430_v44 = vsel %vm428_vm6, %v427_v42, %v429_v43 }
 0x2fa   :  { %1357 = vmatmul.mubr.msk.f32.vlgmr.msra.gmra.mrb[4].mxu1 %vm60_vm1, %v430_v44 }
 0x2fb   :  { %1378 = vmatprep.mubr.msk.f32.mxu1 %vm1579_vm0, %v1580_v4 }
 0x3cd   :  { %v504_v49 = vpop.f32.mrb[4].mxu1 }
 0x3ce   :  { %v505_v51 = vadd.f32 %v504_v49, %v1861_v48  ;;  %v1358_v52 = vpop.f32.mrb[5].mxu1 }
 0x3d0   :  { %v508_v53 = vadd.f32 %v505_v51, %v1863_v50 }
 0x3d2   :  { %v509_v54 = vsel %vm60_vm1, %v508_v53, 0.0 }
 0x3d3   :  { %510 = vadd.xlane.f32.xlu1 %v509_v54 }
 0x460   :  { %v511_v56 = vpop.xlane.xlu1 %510 }
 0x461   :  { %v512_v57 = vmul.f32 0.03125, %v511_v56 }
 0x463   :  { %v513_v58 = vsub.f32 %v508_v53, %v512_v57 }
 0x465   :  { %v514_v59 = vmul.f32 %v513_v58, %v513_v58 }
 0x467   :  { %v515_v60 = vsel %vm60_vm1, %v514_v59, 0.0 }
 0x468   :  { %516 = vadd.xlane.f32.xlu1 %v515_v60 }
 0x479   :  { %626 = vrot.lane.b32.xlu1 %v1847_v37, %s1581_s8 }
 0x47d   :  { %631 = vrot.lane.b32.xlu1 %v1850_v39, %s1581_s8 }
 0x4f5   :  { %v517_v5 = vpop.xlane.xlu1 %516 }
 0x4f6   :  { %v518_v6 = vmul.f32 0.03125, %v517_v5 }
 0x4f8   :  { %v519_v7 = vadd.f32 1e-05, %v518_v6 }
 0x4f9   :  { %v627_v36 = vpop.permute.xlu1 %626 }
 0x4fa   :  { %1568 = vrsqrt.f32 %v519_v7 }
 0x4fd   :  { %v632_v38 = vpop.permute.xlu1 %631 }
 0x504   :  { %v1569_v12 = vpop.eup %1568 }
 0x505   :  { %v521_v13 = vmul.f32 %v1569_v12, %v513_v58 }
 0x507   :  { %v526_v15 = vmul.f32 %v1898_v11, %v521_v13 }
 0x509   :  { %v531_v16 = vadd.f32 %v1901_v14, %v526_v15 }
 0x50b   :  { %vm532_vm7 = vcmp.ge.f32.partialorder %v531_v16, 0.0  ;;  %v533_v17 = vmul.f32 0.02, %v531_v16 }
 0x50d   :  { %v534_v18 = vsel %vm532_vm7, %v531_v16, %v533_v17 }
 0x50e   :  { %1368 = vmatmul.mubr.msk.f32.vlgmr.msra.gmra.mrb[4].mxu0 %vm60_vm1, %v534_v18 }
 0x50f   :  { %1389 = vmatprep.mubr.msk.f32.mxu0 %vm1579_vm0, %v1580_v4 }
 0x5e1   :  { %v608_v21 = vpop.f32.mrb[4].mxu0 }
 0x5e2   :  { %v609_v22 = vadd.f32 %v608_v21, %v1914_v20  ;;  %v1369_v23 = vpop.f32.mrb[5].mxu0 }
 0x5e4   :  { %v612_v24 = vsel %vm60_vm1, %v609_v22, 0.0 }
 0x5e5   :  { %613 = vadd.xlane.f32.xlu0 %v612_v24 }
 0x5fb   :  { %1527 = vrot.lane.b32.xlu0 %v1920_v25, %s1581_s8 }
 0x5ff   :  { %655 = vrot.lane.b32.xlu0 %v1861_v48, %s1581_s8 }
 0x672   :  { %v614_v55 = vpop.xlane.xlu0 %613 }
 0x673   :  { %v615_v10 = vmul.f32 0.03125, %v614_v55 }
 0x675   :  { %v616_v28 = vsub.f32 %v609_v22, %v615_v10 }
 0x676   :  { %v1528_v26 = vpop.permute.xlu0 %1527 }
 0x677   :  { %v617_v31 = vmul.f32 %v616_v28, %v616_v28  ;;  %v1530_v27 = vunpack.i.h.bf16 %v1528_v26  ;;  %v1529_v34 = vunpack.i.l.bf16 %v1528_v26 }
 0x679   :  { %v618_v32 = vsel %vm60_vm1, %v617_v31, 0.0  ;;  %v1492_v35 = vpack.c.bf16 %v1530_v27, %v1529_v34 }
 0x67a   :  { %619 = vadd.xlane.f32.xlu1 %v618_v32  ;;  %v656_v53 = vpop.permute.xlu0 %655 }
 0x67b   :  { %1493 = vmatpush3.bf16.msra.mxu1 %v1492_v35 }
 0x67c   :  { %1494 = vmatprep.subr.bf16.mxu1 %v1578_v0 }
 0x68b   :  { %1532 = vrot.lane.b32.xlu1 %v1929_v33, %s1581_s8 }
 0x68f   :  { %732 = vrot.lane.b32.xlu1 %v1863_v50, %s1581_s8 }
 0x693   :  { %750 = vrot.lane.b32.xlu1 %v1898_v11, %s1581_s8 }
 0x707   :  { %v620_v29 = vpop.xlane.xlu1 %619 }
 0x708   :  { %v621_v30 = vmul.f32 0.03125, %v620_v29 }
 0x70a   :  { %v622_v40 = vadd.f32 1e-05, %v621_v30 }
 0x70b   :  { %v1533_v41 = vpop.permute.xlu1 %1532 }
 0x70c   :  { %1570 = vrsqrt.f32 %v622_v40  ;;  %v1535_v42 = vunpack.i.h.bf16 %v1533_v41  ;;  %v1534_v43 = vunpack.i.l.bf16 %v1533_v41 }
 0x70e   :  { %v1495_v44 = vpack.c.bf16 %v1535_v42, %v1534_v43 }
 0x70f   :  { %v733_v58 = vpop.permute.xlu1 %732 }
 0x710   :  { %1496 = vmatpush3.bf16.msra.mxu1 %v1495_v44 }
 0x711   :  { %1503 = vmatprep.subr.bf16.mxu1 %v1578_v0 }
 0x713   :  { %v751_v15 = vpop.permute.xlu1 %750 }
 0x716   :  { %v1571_v45 = vpop.eup %1570 }
 0x717   :  { %v624_v46 = vmul.f32 %v1571_v45, %v616_v28 }
 0x719   :  { %v629_v47 = vmul.f32 %v627_v36, %v624_v46 }
 0x71b   :  { %v634_v49 = vadd.f32 %v632_v38, %v629_v47 }
 0x71d   :  { %vm635_vm8 = vcmp.ge.f32.partialorder %v634_v49, 0.0  ;;  %v636_v51 = vmul.f32 0.02, %v634_v49 }
 0x71f   :  { %v637_v52 = vsel %vm635_vm8, %v634_v49, %v636_v51 }
 0x720   :  { %1379 = vmatmul.mubr.msk.f32.vlgmr.msra.gmra.mrb[6].mxu1 %vm60_vm1, %v637_v52 }
 0x721   :  { %1400 = vmatprep.mubr.msk.f32.mxu1 %vm1579_vm0, %v1580_v4 }
 0x7f3   :  { %v727_v54 = vpop.f32.mrb[6].mxu1 }
 0x7f4   :  { %v728_v56 = vadd.f32 %v727_v54, %v656_v53  ;;  %v1380_v57 = vpop.f32.mrb[7].mxu1 }
 0x7f6   :  { %v735_v59 = vadd.f32 %v733_v58, %v728_v56 }
 0x7f8   :  { %v736_v60 = vsel %vm60_vm1, %v735_v59, 0.0 }
 0x7f9   :  { %737 = vadd.xlane.f32.xlu0 %v736_v60 }
 0x80f   :  { %1537 = vrot.lane.b32.xlu0 %v1945_v63, %s1581_s8 }
 0x813   :  { %755 = vrot.lane.b32.xlu0 %v1901_v14, %s1581_s8 }
 0x817   :  { %779 = vrot.lane.b32.xlu0 %v1914_v20, %s1581_s8 }
 0x886   :  { %v738_v3 = vpop.xlane.xlu0 %737 }
 0x887   :  { %v739_v5 = vmul.f32 0.03125, %v738_v3 }
 0x889   :  { %v740_v6 = vsub.f32 %v735_v59, %v739_v5 }
 0x88a   :  { %v1538_v62 = vpop.permute.xlu0 %1537 }
 0x88b   :  { %v741_v7 = vmul.f32 %v740_v6, %v740_v6  ;;  %v1540_v9 = vunpack.i.h.bf16 %v1538_v62  ;;  %v1539_v12 = vunpack.i.l.bf16 %v1538_v62 }
 0x88d   :  { %v742_v8 = vsel %vm60_vm1, %v741_v7, 0.0  ;;  %v1498_v13 = vpack.c.bf16 %v1540_v9, %v1539_v12 }
 0x88e   :  { %743 = vadd.xlane.f32.xlu1 %v742_v8  ;;  %v756_v24 = vpop.permute.xlu0 %755 }
 0x88f   :  { %1499 = vmatpush3.bf16.msra.mxu0 %v1498_v13 }
 0x890   :  { %1500 = vmatprep.subr.bf16.mxu0 %v1578_v0 }
 0x892   :  { %v780_v32 = vpop.permute.xlu0 %779 }
 0x89f   :  { %1542 = vrot.lane.b32.xlu1 %v1956_v61, %s1581_s8 }
 0x91b   :  { %v744_v16 = vpop.xlane.xlu1 %743 }
 0x91c   :  { %v745_v17 = vmul.f32 0.03125, %v744_v16 }
 0x91e   :  { %v746_v18 = vadd.f32 1e-05, %v745_v17 }
 0x91f   :  { %v1543_v19 = vpop.permute.xlu1 %1542 }
 0x920   :  { %1572 = vrsqrt.f32 %v746_v18  ;;  %v1545_v21 = vunpack.i.h.bf16 %v1543_v19  ;;  %v1544_v22 = vunpack.i.l.bf16 %v1543_v19 }
 0x922   :  { %v1501_v1 = vpack.c.bf16 %v1545_v21, %v1544_v22 }
 0x924   :  { %1502 = vmatpush3.bf16.msra.mxu0 %v1501_v1 }
 0x925   :  { %1509 = vmatprep.subr.bf16.mxu0 %v1578_v0 }
 0x92a   :  { %v1573_v2 = vpop.eup %1572 }
 0x92b   :  { %v748_v23 = vmul.f32 %v1573_v2, %v740_v6 }
 0x92d   :  { %v753_v55 = vmul.f32 %v751_v15, %v748_v23 }
 0x92f   :  { %v758_v10 = vadd.f32 %v756_v24, %v753_v55 }
 0x931   :  { %vm759_vm9 = vcmp.ge.f32.partialorder %v758_v10, 0.0  ;;  %v760_v28 = vmul.f32 0.02, %v758_v10 }
 0x933   :  { %v761_v31 = vsel %vm759_vm9, %v758_v10, %v760_v28 }
 0x934   :  { %1390 = vmatmul.mubr.msk.f32.vlgmr.msra.gmra.mrb[6].mxu0 %vm60_vm1, %v761_v31 }
 0x935   :  { %1411 = vmatprep.mubr.msk.f32.mxu0 %vm1579_vm0, %v1580_v4 }
 0xa07   :  { %v851_v26 = vpop.f32.mrb[6].mxu0 }
 0xa08   :  { %v852_v27 = vadd.f32 %v851_v26, %v780_v32  ;;  %v1391_v34 = vpop.f32.mrb[7].mxu0  ;;  %v1088_v32 = vld [vmem:[%s2029_s10 + $0x10] sm:$0xff] }
 0xa0a   :  { %v855_v35 = vsel %vm60_vm1, %v852_v27, 0.0 }
 0xa0b   :  { %856 = vadd.xlane.f32.xlu1 %v855_v35 }
 0xa1c   :  { %868 = vrot.lane.b32.xlu1 %v1847_v37, %s1582_s4 }
 0xa20   :  { %872 = vrot.lane.b32.xlu1 %v1850_v39, %s1582_s4 }
 0xa24   :  { %891 = vrot.lane.b32.xlu1 %v1861_v48, %s1582_s4 }
 0xa98   :  { %v857_v36 = vpop.xlane.xlu1 %856 }
 0xa99   :  { %v858_v38 = vmul.f32 0.03125, %v857_v36 }
 0xa9b   :  { %v859_v29 = vsub.f32 %v852_v27, %v858_v38 }
 0xa9c   :  { %v869_v49 = vpop.permute.xlu1 %868 }
 0xa9d   :  { %v860_v30 = vmul.f32 %v859_v29, %v859_v29 }
 0xa9f   :  { %v861_v40 = vsel %vm60_vm1, %v860_v30, 0.0  ;;  %v1184_v30 = vld [vmem:[%s2030_s11] ss:$0 sm:$0xff] }
 0xaa0   :  { %862 = vadd.xlane.f32.xlu0 %v861_v40  ;;  %v873_v51 = vpop.permute.xlu1 %872 }
 0xaa4   :  { %v892_v57 = vpop.permute.xlu1 %891 }
 0xab6   :  { %1547 = vrot.lane.b32.xlu0 %v1920_v25, %s1582_s4 }
 0xaba   :  { %1552 = vrot.lane.b32.xlu0 %v1929_v33, %s1582_s4 }
 0xabe   :  { %967 = vrot.lane.b32.xlu0 %v1863_v50, %s1582_s4 }
 0xb2d   :  { %v863_v37 = vpop.xlane.xlu0 %862 }
 0xb2e   :  { %v864_v39 = vmul.f32 0.03125, %v863_v37 }
 0xb30   :  { %v865_v41 = vadd.f32 1e-05, %v864_v39 }
 0xb31   :  { %v1548_v48 = vpop.permute.xlu0 %1547 }
 0xb32   :  { %1574 = vrsqrt.f32 %v865_v41  ;;  %v1550_v42 = vunpack.i.h.bf16 %v1548_v48  ;;  %v1549_v43 = vunpack.i.l.bf16 %v1548_v48 }
 0xb34   :  { %v1504_v44 = vpack.c.bf16 %v1550_v42, %v1549_v43 }
 0xb35   :  { %v1553_v45 = vpop.permute.xlu0 %1552 }
 0xb36   :  { %v1555_v46 = vunpack.i.h.bf16 %v1553_v45  ;;  %v1554_v47 = vunpack.i.l.bf16 %v1553_v45  ;;  %1505 = vmatpush3.bf16.msra.mxu1 %v1504_v44 }
 0xb37   :  { %1506 = vmatprep.subr.bf16.mxu1 %v1578_v0 }
 0xb38   :  { %v1507_v25 = vpack.c.bf16 %v1555_v46, %v1554_v47 }
 0xb39   :  { %v968_v3 = vpop.permute.xlu0 %967 }
 0xb3a   :  { %1508 = vmatpush3.bf16.msra.mxu1 %v1507_v25 }
 0xb3b   :  { %1515 = vmatprep.subr.bf16.mxu1 %v1578_v0 }
 0xb3c   :  { %v1575_v50 = vpop.eup %1574 }
 0xb3d   :  { %v867_v33 = vmul.f32 %v1575_v50, %v859_v29 }
 0xb3f   :  { %v871_v52 = vmul.f32 %v869_v49, %v867_v33 }
 0xb41   :  { %v875_v53 = vadd.f32 %v873_v51, %v871_v52 }
 0xb43   :  { %vm876_vm10 = vcmp.ge.f32.partialorder %v875_v53, 0.0  ;;  %v877_v54 = vmul.f32 0.02, %v875_v53 }
 0xb45   :  { %v878_v56 = vsel %vm876_vm10, %v875_v53, %v877_v54 }
 0xb46   :  { %1401 = vmatmul.mubr.msk.f32.vlgmr.msra.gmra.mrb[8].mxu1 %vm60_vm1, %v878_v56 }
 0xb47   :  { %1422 = vmatprep.mubr.msk.f32.mxu1 %vm1579_vm0, %v1580_v4 }
 0xc19   :  { %v963_v58 = vpop.f32.mrb[8].mxu1 }
 0xc1a   :  { %v964_v59 = vadd.f32 %v963_v58, %v892_v57  ;;  %v1402_v60 = vpop.f32.mrb[9].mxu1 }
 0xc1c   :  { %v970_v5 = vadd.f32 %v968_v3, %v964_v59 }
 0xc1e   :  { %v971_v6 = vsel %vm60_vm1, %v970_v5, 0.0 }
 0xc1f   :  { %972 = vadd.xlane.f32.xlu1 %v971_v6 }
 0xc30   :  { %984 = vrot.lane.b32.xlu1 %v1898_v11, %s1582_s4  ;;  %v1086_v11 = vld [vmem:[%s2029_s10] sm:$0xff] }
 0xc34   :  { %988 = vrot.lane.b32.xlu1 %v1901_v14, %s1582_s4  ;;  %v1087_v14 = vld [vmem:[%s2029_s10 + $0x8] sm:$0xff] }
 0xc38   :  { %1007 = vrot.lane.b32.xlu1 %v1914_v20, %s1582_s4  ;;  %v1516_v20 = vpack.c.bf16 %v1087_v14, %v1086_v11 }
 0xc3a   :  { %1517 = vmatpush3.bf16.msra.mxu1 %v1516_v20 }
 0xc3b   :  { %1518 = vmatprep.subr.bf16.mxu1 %v1578_v0 }
 0xcac   :  { %v973_v7 = vpop.xlane.xlu1 %972 }
 0xcad   :  { %v974_v4 = vmul.f32 0.03125, %v973_v7 }
 0xcaf   :  { %v975_v8 = vsub.f32 %v970_v5, %v974_v4 }
 0xcb0   :  { %v985_v22 = vpop.permute.xlu1 %984 }
 0xcb1   :  { %v976_v62 = vmul.f32 %v975_v8, %v975_v8 }
 0xcb3   :  { %v977_v9 = vsel %vm60_vm1, %v976_v62, 0.0 }
 0xcb4   :  { %978 = vadd.xlane.f32.xlu0 %v977_v9  ;;  %v989_v24 = vpop.permute.xlu1 %988 }
 0xcb8   :  { %v1008_v27 = vpop.permute.xlu1 %1007 }
 0xcca   :  { %1557 = vrot.lane.b32.xlu0 %v1945_v63, %s1582_s4 }
 0xcce   :  { %1562 = vrot.lane.b32.xlu0 %v1956_v61, %s1582_s4 }
 0xd41   :  { %v979_v12 = vpop.xlane.xlu0 %978 }
 0xd42   :  { %v980_v13 = vmul.f32 0.03125, %v979_v12 }
 0xd44   :  { %v981_v15 = vadd.f32 1e-05, %v980_v13 }
 0xd45   :  { %v1558_v16 = vpop.permute.xlu0 %1557 }
 0xd46   :  { %1576 = vrsqrt.f32 %v981_v15  ;;  %v1560_v63 = vunpack.i.h.bf16 %v1558_v16  ;;  %v1559_v17 = vunpack.i.l.bf16 %v1558_v16 }
 0xd48   :  { %v1510_v61 = vpack.c.bf16 %v1560_v63, %v1559_v17 }
 0xd49   :  { %v1563_v18 = vpop.permute.xlu0 %1562 }
 0xd4a   :  { %v1565_v19 = vunpack.i.h.bf16 %v1563_v18  ;;  %v1564_v21 = vunpack.i.l.bf16 %v1563_v18  ;;  %1511 = vmatpush3.bf16.msra.mxu0 %v1510_v61 }
 0xd4b   :  { %1512 = vmatprep.subr.bf16.mxu0 %v1578_v0  ;;  %v1089_v0 = vld [vmem:[%s2029_s10 + $0x18] sm:$0xff] }
 0xd4c   :  { %v1513_v1 = vpack.c.bf16 %v1565_v19, %v1564_v21  ;;  %v1519_v26 = vpack.c.bf16 %v1089_v0, %v1088_v32 }
 0xd4e   :  { %1514 = vmatpush3.bf16.msra.mxu0 %v1513_v1  ;;  %1520 = vmatpush3.bf16.msra.mxu1 %v1519_v26 }
 0xd50   :  { %v1577_v2 = vpop.eup %1576 }
 0xd51   :  { %v983_v23 = vmul.f32 %v1577_v2, %v975_v8 }
 0xd53   :  { %v987_v55 = vmul.f32 %v985_v22, %v983_v23 }
 0xd55   :  { %v991_v10 = vadd.f32 %v989_v24, %v987_v55 }
 0xd57   :  { %vm992_vm11 = vcmp.ge.f32.partialorder %v991_v10, 0.0  ;;  %v993_v28 = vmul.f32 0.02, %v991_v10 }
 0xd59   :  { %v994_v31 = vsel %vm992_vm11, %v991_v10, %v993_v28 }
 0xd5a   :  { %1412 = vmatmul.mubr.msk.f32.vlgmr.msra.gmra.mrb[8].mxu0 %vm60_vm1, %v994_v31 }
 0xe2d   :  { %v1079_v34 = vpop.f32.mrb[8].mxu0 }
 0xe2e   :  { %v1080_v35 = vadd.f32 %v1079_v34, %v1008_v27  ;;  %v1413_v36 = vpop.f32.mrb[9].mxu0 }
 0xe30   :  { %vm1083_vm12 = vcmp.ge.f32.partialorder %v1080_v35, 0.0  ;;  %v1084_v38 = vmul.f32 0.02, %v1080_v35 }
 0xe32   :  { %v1085_v29 = vsel %vm1083_vm12, %v1080_v35, %v1084_v38 }
 0xe33   :  { %1423 = vmatmul.mubr.msk.f32.vlgmr.msra.gmra.mrb[10].mxu1 %vm60_vm1, %v1085_v29 }
 0xf06   :  { %v1166_v40 = vpop.f32.mrb[10].mxu1 }
 0xf07   :  { %v1167_v37 = vadd.f32 %v1184_v30, %v1166_v40  ;;  %v1424_v39 = vpop.f32.mrb[11].mxu1 }
 0xf09   :  { %1170 = vst.msk [vmem:[%s2031_s12] sm:$0xff] %vm326_vm4, %v1167_v37 }

</bundles_post_ra>
